<compile_context>
chip_gen: v6e
topology: v6e:2x2x1
jax: 0.10.0
libtpu: 0.0.40
codegen_flags: <defaults>
</compile_context>

<pallas_src>
import jax
import jax.numpy as jnp
from jax import lax
from jax.experimental import pallas as pl
from jax.experimental.pallas import tpu as pltpu


def mamba_block_kernel(
    seq_ref,      # (Lc, d_input)                    current L-chunk of the input (f32)
    w_in_ref,     # (d_input, 2*d_model)             fused in_proj (transposed, compute dtype)
    conv_w_ref,   # (K, d_model)                     depthwise conv taps (tap k = torch weight[:,0,k]) f32
    conv_b_ref,   # (1, d_model)                     f32
    w_bcd_ref,    # (d_model, pad128(2*d_state+d_discr))  fused s_B | s_C | s_D[0] (transposed, compute dtype)
    w_D2_ref,     # (d_discr, d_model)               s_D[1] (transposed, compute dtype)
    expA_ref,     # (d_state, d_model)               exp(-A) transposed, f32
    D_ref,        # (1, d_model)                     f32
    w_out_ref,    # (d_model, d_input)               out_proj (transposed, compute dtype)
    out_ref,      # (Lc, d_input)
    # --- VMEM scratch (persists across grid steps) ---
    h_scr,        # (d_state, d_model)   SSM hidden state carried across L-chunks
    carry_scr,    # (8, d_model)         last 8 pre-conv rows of previous chunk (carried)
    ext_scr,      # (Lc+8, d_model)      sublane-aligned conv staging buffer
    y_scr,        # (Lc, d_model)        gated scan outputs
    aact_scr,     # (Lc, d_model)        post-conv silu activations
    s_scr,        # (Lc, d_model)        softplus discretization
    gate_scr,     # (Lc, d_model)        silu(gate), staged (not live across the scan)
    b_scr,        # (Lc, d_state)        B
    c_scr,        # (Lc, d_state)        C
):
    Lc = seq_ref.shape[0]
    d_model = w_out_ref.shape[0]
    d_state = expA_ref.shape[0]
    d_discr = w_D2_ref.shape[0]
    K = conv_w_ref.shape[0]
    cd = w_in_ref.dtype                     # MXU operand dtype (f32 or bf16)

    chunk = pl.program_id(1)

    @pl.when(chunk == 0)
    def _init():
        h_scr[...] = jnp.zeros_like(h_scr)
        carry_scr[...] = jnp.zeros_like(carry_scr)

    # ---- fused in_proj: one matmul, slice the two halves --------------------
    seq = seq_ref[...].astype(cd)
    ab = jnp.dot(seq, w_in_ref[...], preferred_element_type=jnp.float32)  # (Lc, 2*d_model) f32
    a = ab[:, :d_model]
    gate_scr[...] = jax.nn.silu(ab[:, d_model:])     # stage; not kept live across the scan

    # ---- causal depthwise conv1d (aligned staging buffer) --------------------
    # conv[t, c] = bias[c] + sum_j w[K-1-j, c] * a_global[t-j, c]
    ext_scr[0:8, :] = carry_scr[...]                 # previous chunk's last 8 pre-conv rows
    ext_scr[8:8 + Lc, :] = a                         # sublane-aligned main slab
    carry_scr[...] = a[Lc - 8:, :]                   # tail for the next chunk
    cw = conv_w_ref[...]                             # (K, d_model)
    conv = conv_b_ref[...]                           # (1, d_model)
    for j in range(K):
        conv = conv + ext_scr[8 - j:8 - j + Lc, :] * cw[K - 1 - j:K - j, :]
    a_act = jax.nn.silu(conv)                        # (Lc, d_model) f32

    # ---- fused B / C / D1 projections (lane-padded), then D2 + softplus ------
    bcd = jnp.dot(a_act.astype(cd), w_bcd_ref[...], preferred_element_type=jnp.float32)
    b_scr[...] = bcd[:, :d_state]
    c_scr[...] = bcd[:, d_state:2 * d_state]
    d1 = bcd[:, 2 * d_state:2 * d_state + d_discr]   # (Lc, d_discr)
    sD = jnp.dot(d1.astype(cd), w_D2_ref[...], preferred_element_type=jnp.float32)
    s_scr[...] = jax.nn.softplus(D_ref[...] + sD)    # (Lc, d_model) f32
    aact_scr[...] = a_act

    # ---- selective scan: d_model-tiled, 8-step sub-blocks, f32 throughout ----
    dmt = d_model
    if d_model > 512:
        for cand in (512, 256, 128):
            if d_model % cand == 0:
                dmt = cand
                break
    n_sub = Lc // 8

    for c0 in range(0, d_model, dmt):
        expA_t = expA_ref[:, pl.ds(c0, dmt)]         # (d_state, dmt), loaded once per tile
        D_t = D_ref[:, pl.ds(c0, dmt)]               # (1, dmt)
        h0 = h_scr[:, pl.ds(c0, dmt)]                # carried state slice for this tile

        def sub_block(i, h):
            t8 = pl.multiple_of(i * 8, 8)
            # aligned (8, d_state) tiles, one small transpose per sub-block
            bT8 = b_scr[pl.ds(t8, 8), :].T           # (d_state, 8)
            cT8 = c_scr[pl.ds(t8, 8), :].T           # (d_state, 8)
            s_blk = s_scr[pl.ds(t8, 8), pl.ds(c0, dmt)]      # (8, dmt)
            a_blk = aact_scr[pl.ds(t8, 8), pl.ds(c0, dmt)]   # (8, dmt)
            g_blk = gate_scr[pl.ds(t8, 8), pl.ds(c0, dmt)]   # (8, dmt)
            rows = []
            for j in range(8):
                s_t = s_blk[j:j + 1, :]              # (1, dmt)
                a_t = a_blk[j:j + 1, :]              # (1, dmt)
                h = (expA_t * s_t) * h + bT8[:, j:j + 1] * (s_t * a_t)
                rows.append(jnp.sum(cT8[:, j:j + 1] * h, axis=0, keepdims=True)
                            + D_t * a_t)
            # one aligned (8, dmt) store, gating fused in
            y_scr[pl.ds(t8, 8), pl.ds(c0, dmt)] = jnp.concatenate(rows, axis=0) * g_blk
            return h

        h_scr[:, pl.ds(c0, dmt)] = lax.fori_loop(0, n_sub, sub_block, h0)

    # ---- out_proj -------------------------------------------------------------
    out_ref[...] = jnp.dot(
        y_scr[...].astype(cd), w_out_ref[...], preferred_element_type=jnp.float32
    ).astype(out_ref.dtype)


def mamba_block_forward(seq, params, ker_size=4, l_chunk=None,
                        compute_dtype=jnp.float32):
    """seq: (batch, L, d_input) float32.  Returns (batch, L, d_input) float32.

    compute_dtype: dtype of the projection weights / MXU operands (f32 or bf16).
    All scan / elementwise math stays f32.
    """
    b, L, d_input = seq.shape
    d_model = params["w_in"].shape[0] // 2
    d_state = params["s_B"].shape[0]
    d_discr = params["s_D1"].shape[0]
    K = ker_size
    cd = compute_dtype

    if l_chunk is None:
        l_chunk = L if L <= 256 else 256
    assert L % l_chunk == 0, "L must be divisible by l_chunk"
    assert l_chunk % 8 == 0 and l_chunk >= 8, "l_chunk must be a multiple of 8 (>= 8)"
    n_chunks = L // l_chunk

    # ---- parameter glue (transposes so the kernel does x @ W directly) -------
    w_in_T = params["w_in"].T.astype(cd)                        # (d_input, 2*d_model)
    conv_w = params["conv_w"][:, 0, :].T.astype(jnp.float32)    # (K, d_model)
    conv_b = params["conv_b"].reshape(1, d_model).astype(jnp.float32)
    w_bcd = jnp.concatenate(
        [params["s_B"].T, params["s_C"].T, params["s_D1"].T], axis=1)
    pad = (-w_bcd.shape[1]) % 128                               # lane-pad to mult of 128
    if pad:
        w_bcd = jnp.pad(w_bcd, ((0, 0), (0, pad)))
    w_bcd = w_bcd.astype(cd)                                    # (d_model, pad128(2*ds+dd))
    w_D2 = params["s_D2"].T.astype(cd)                          # (d_discr, d_model)
    expA_T = jnp.exp(-params["A"]).T.astype(jnp.float32)        # (d_state, d_model)
    D_row = params["D"].reshape(1, d_model).astype(jnp.float32)
    w_out = params["out_proj"].T.astype(cd)                     # (d_model, d_input)

    weights = [w_in_T, conv_w, conv_b, w_bcd, w_D2, expA_T, D_row, w_out]

    # ---- VMEM budget derived from shapes, clamped to the chip ----------------
    weight_bytes = sum(int(w.size) * w.dtype.itemsize for w in weights)
    scratch_bytes = 4 * (
        d_state * d_model + 8 * d_model + (l_chunk + 8) * d_model
        + 4 * l_chunk * d_model + 2 * l_chunk * d_state)
    io_bytes = 4 * l_chunk * d_input * 2
    need = 2 * weight_bytes + scratch_bytes + 2 * io_bytes + (4 << 20)
    try:
        cap = int(pltpu.get_tpu_info().vmem_capacity_bytes)
    except Exception:
        cap = 64 << 20
    vmem_limit = int(max(32 << 20, min(need, (cap * 9) // 10)))

    def w_spec(w):
        nd = w.ndim
        return pl.BlockSpec(w.shape, lambda i, c, _nd=nd: (0,) * _nd)

    return pl.pallas_call(
        mamba_block_kernel,
        out_shape=jax.ShapeDtypeStruct((b, L, d_input), jnp.float32),
        grid=(b, n_chunks),
        in_specs=[pl.BlockSpec((None, l_chunk, d_input), lambda i, c: (i, c, 0))]
                 + [w_spec(w) for w in weights],
        out_specs=pl.BlockSpec((None, l_chunk, d_input), lambda i, c: (i, c, 0)),
        scratch_shapes=[
            pltpu.VMEM((d_state, d_model), jnp.float32),          # h (carried)
            pltpu.VMEM((8, d_model), jnp.float32),                # conv carry (carried)
            pltpu.VMEM((l_chunk + 8, d_model), jnp.float32),      # conv staging (aligned)
            pltpu.VMEM((l_chunk, d_model), jnp.float32),          # y (gated)
            pltpu.VMEM((l_chunk, d_model), jnp.float32),          # a_act
            pltpu.VMEM((l_chunk, d_model), jnp.float32),          # s
            pltpu.VMEM((l_chunk, d_model), jnp.float32),          # silu(gate)
            pltpu.VMEM((l_chunk, d_state), jnp.float32),          # B
            pltpu.VMEM((l_chunk, d_state), jnp.float32),          # C
        ],
        compiler_params=pltpu.CompilerParams(
            dimension_semantics=("parallel", "arbitrary"),
            vmem_limit_bytes=vmem_limit,
        ),
    )(seq, *weights)


def mamba_block_ref(seq, params, ker_size=4):
    """Pure-JAX reference mirroring the PyTorch forward (cache=None)."""
    b, L, d_input = seq.shape
    d_model = params["w_in"].shape[0] // 2
    K = ker_size

    ab = seq @ params["w_in"].T
    a, gate = ab[..., :d_model], ab[..., d_model:]

    x = jnp.swapaxes(a, 1, 2)                                  # (b, d_model, L)
    xp = jnp.pad(x, ((0, 0), (0, 0), (K - 1, K - 1)))
    w = params["conv_w"][:, 0, :]                              # (d_model, K)
    conv = params["conv_b"][None, :, None] + sum(
        w[None, :, k, None] * xp[:, :, k:k + L] for k in range(K))
    a = jax.nn.silu(jnp.swapaxes(conv, 1, 2))                  # (b, L, d_model)

    B = a @ params["s_B"].T
    C = a @ params["s_C"].T
    s = jax.nn.softplus(params["D"] + (a @ params["s_D1"].T) @ params["s_D2"].T)
    A_bar = jnp.exp(-params["A"])[None, None] * s[..., None]   # (b, L, d, n)
    X_bar = B[:, :, None, :] * s[..., None] * a[..., None]

    def step(h, inp):
        A_t, X_t = inp
        h = A_t * h + X_t
        return h, h

    A_s = jnp.moveaxis(A_bar, 1, 0)
    X_s = jnp.moveaxis(X_bar, 1, 0)
    d, n = A_bar.shape[2], A_bar.shape[3]
    _, hid = lax.scan(step, jnp.zeros((b, d, n), jnp.float32), (A_s, X_s))
    hid = jnp.moveaxis(hid, 0, 1)                              # (b, L, d, n)

    y = jnp.einsum("blds,bls->bld", hid, C) + params["D"] * a
    return (y * jax.nn.silu(gate)) @ params["out_proj"].T


if __name__ == "__main__":
    # Small shapes consistent with the module: d_discr = d_model // 16.
    d_input, d_model, d_state, ker_size = 8, 32, 16, 4
    d_discr = d_model // 16
    batch, L, l_chunk = 2, 32, 16   # 2 L-chunks x 2 sub-blocks -> exercises carried state

    key = jax.random.PRNGKey(0)
    keys = jax.random.split(key, 9)
    params = {
        "w_in":     jax.random.normal(keys[0], (2 * d_model, d_input), jnp.float32) * 0.1,
        "out_proj": jax.random.normal(keys[1], (d_input, d_model), jnp.float32) * 0.1,
        "s_B":      jax.random.normal(keys[2], (d_state, d_model), jnp.float32) * 0.1,
        "s_C":      jax.random.normal(keys[3], (d_state, d_model), jnp.float32) * 0.1,
        "s_D1":     jax.random.normal(keys[4], (d_discr, d_model), jnp.float32) * 0.1,
        "s_D2":     jax.random.normal(keys[5], (d_model, d_discr), jnp.float32) * 0.1,
        "conv_w":   jax.random.normal(keys[6], (d_model, 1, ker_size), jnp.float32) * 0.1,
        "conv_b":   jax.random.normal(keys[7], (d_model,), jnp.float32) * 0.1,
        # A = arange(1, d_state+1) repeated for every channel, D = ones (as in __init__)
        "A": jnp.tile(jnp.arange(1, d_state + 1, dtype=jnp.float32), (d_model, 1)),
        "D": jnp.ones((d_model,), jnp.float32),
    }
    seq = jax.random.normal(keys[8], (batch, L, d_input), jnp.float32)

    ref = mamba_block_ref(seq, params, ker_size=ker_size)

    # f32 MXU path (tight tolerance)
    out = mamba_block_forward(seq, params, ker_size=ker_size, l_chunk=l_chunk)
    out = jax.block_until_ready(out)
    assert out.shape == (batch, L, d_input)
    err = float(jnp.max(jnp.abs(out - ref)))
    assert err < 1e-4, f"f32 max abs error {err}"

    # bf16 MXU path (weights + matmul operands bf16, f32 accumulate, f32 scan)
    out_bf = mamba_block_forward(seq, params, ker_size=ker_size, l_chunk=l_chunk,
                                 compute_dtype=jnp.bfloat16)
    out_bf = jax.block_until_ready(out_bf)
    err_bf = float(jnp.max(jnp.abs(out_bf - ref)))
    assert err_bf < 1e-2, f"bf16 max abs error {err_bf}"

    print("KERNEL_OK")
</pallas_src>

<mosaic_0001>
module attributes {stable_mosaic.version = 11 : i64} {
  func.func @mamba_block_kernel(%arg0: i32, %arg1: i32, %arg2: memref<1x16x8xf32, #tpu.memory_space<vmem>>, %arg3: memref<8x64xf32, #tpu.memory_space<vmem>>, %arg4: memref<4x32xf32, #tpu.memory_space<vmem>>, %arg5: memref<1x32xf32, #tpu.memory_space<vmem>>, %arg6: memref<32x128xf32, #tpu.memory_space<vmem>>, %arg7: memref<2x32xf32, #tpu.memory_space<vmem>>, %arg8: memref<16x32xf32, #tpu.memory_space<vmem>>, %arg9: memref<1x32xf32, #tpu.memory_space<vmem>>, %arg10: memref<32x8xf32, #tpu.memory_space<vmem>>, %arg11: memref<1x16x8xf32, #tpu.memory_space<vmem>>, %arg12: memref<16x32xf32, #tpu.memory_space<vmem>>, %arg13: memref<8x32xf32, #tpu.memory_space<vmem>>, %arg14: memref<24x32xf32, #tpu.memory_space<vmem>>, %arg15: memref<16x32xf32, #tpu.memory_space<vmem>>, %arg16: memref<16x32xf32, #tpu.memory_space<vmem>>, %arg17: memref<16x32xf32, #tpu.memory_space<vmem>>, %arg18: memref<16x32xf32, #tpu.memory_space<vmem>>, %arg19: memref<16x16xf32, #tpu.memory_space<vmem>>, %arg20: memref<16x16xf32, #tpu.memory_space<vmem>>) attributes {dimension_semantics = [#tpu.dimension_semantics<parallel>, #tpu.dimension_semantics<arbitrary>], iteration_bounds = array<i64: 2, 2>, scalar_prefetch = 0 : i64, scratch_operands = 9 : i64, tpu.core_type = #tpu.core_type<tc>, window_params = [{transform_indices = @transform_0, window_bounds = array<i64: 1, 16, 8>}, {pipeline_mode = #tpu.pipeline_mode<synchronous>, transform_indices = @transform_1, window_bounds = array<i64: 8, 64>}, {pipeline_mode = #tpu.pipeline_mode<synchronous>, transform_indices = @transform_2, window_bounds = array<i64: 4, 32>}, {pipeline_mode = #tpu.pipeline_mode<synchronous>, transform_indices = @transform_3, window_bounds = array<i64: 1, 32>}, {pipeline_mode = #tpu.pipeline_mode<synchronous>, transform_indices = @transform_4, window_bounds = array<i64: 32, 128>}, {pipeline_mode = #tpu.pipeline_mode<synchronous>, transform_indices = @transform_5, window_bounds = array<i64: 2, 32>}, {pipeline_mode = #tpu.pipeline_mode<synchronous>, transform_indices = @transform_6, window_bounds = array<i64: 16, 32>}, {pipeline_mode = #tpu.pipeline_mode<synchronous>, transform_indices = @transform_7, window_bounds = array<i64: 1, 32>}, {pipeline_mode = #tpu.pipeline_mode<synchronous>, transform_indices = @transform_8, window_bounds = array<i64: 32, 8>}, {transform_indices = @transform_9, window_bounds = array<i64: 1, 16, 8>}]} {
    %c0_i32 = arith.constant 0 : i32
    %0 = arith.cmpi eq, %arg1, %c0_i32 : i32
    %1 = arith.extui %0 : i1 to i32
    %c0_i32_0 = arith.constant 0 : i32
    %2 = arith.cmpi ne, %1, %c0_i32_0 : i32
    scf.if %2 {
      %cst_61 = arith.constant 0.000000e+00 : f32
      %90 = vector.broadcast %cst_61 : f32 to vector<16x32xf32>
      %c0_62 = arith.constant 0 : index
      %c0_63 = arith.constant 0 : index
      %91 = vector.load %arg12[%c0_62, %c0_63] : memref<16x32xf32, #tpu.memory_space<vmem>>, vector<16x32xf32>
      tpu.vector_store %arg12[%c0_62, %c0_63], %90 {strides = array<i32>} : memref<16x32xf32, #tpu.memory_space<vmem>>, vector<16x32xf32>,
      %cst_64 = arith.constant 0.000000e+00 : f32
      %92 = vector.broadcast %cst_64 : f32 to vector<8x32xf32>
      %c0_65 = arith.constant 0 : index
      %c0_66 = arith.constant 0 : index
      %93 = vector.load %arg13[%c0_65, %c0_66] : memref<8x32xf32, #tpu.memory_space<vmem>>, vector<8x32xf32>
      tpu.vector_store %arg13[%c0_65, %c0_66], %92 {strides = array<i32>} : memref<8x32xf32, #tpu.memory_space<vmem>>, vector<8x32xf32>,
    } else {
    }
    %c0 = arith.constant 0 : index
    %c0_1 = arith.constant 0 : index
    %c0_2 = arith.constant 0 : index
    %3 = vector.load %arg2[%c0, %c0_1, %c0_2] : memref<1x16x8xf32, #tpu.memory_space<vmem>>, vector<1x16x8xf32>
    %4 = vector.shape_cast %3 : vector<1x16x8xf32> to vector<16x8xf32>
    %c0_3 = arith.constant 0 : index
    %c0_4 = arith.constant 0 : index
    %5 = vector.load %arg3[%c0_3, %c0_4] : memref<8x64xf32, #tpu.memory_space<vmem>>, vector<8x64xf32>
    %cst = arith.constant dense<0.000000e+00> : vector<16x64xf32>
    %6 = tpu.matmul %4, %5, %cst {dimension_numbers = #tpu.dot_dimension_numbers<[1], [0], [0], [1], [0, 0, 1, 1], [], []>} : vector<16x8xf32>, vector<8x64xf32>, vector<16x64xf32> -> vector<16x64xf32>
    %7 = vector.extract_strided_slice %6 {offsets = [0, 0], sizes = [16, 32], strides = [1, 1]} : vector<16x64xf32> to vector<16x32xf32>
    %8 = vector.extract_strided_slice %6 {offsets = [0, 32], sizes = [16, 32], strides = [1, 1]} : vector<16x64xf32> to vector<16x32xf32>
    %9 = arith.negf %8 : vector<16x32xf32>
    %10 = math.exp %9 : vector<16x32xf32>
    %cst_5 = arith.constant 1.000000e+00 : f32
    %11 = vector.broadcast %cst_5 : f32 to vector<16x32xf32>
    %12 = arith.addf %11, %10 : vector<16x32xf32>
    %13 = arith.divf %11, %12 : vector<16x32xf32>
    %14 = arith.mulf %8, %13 : vector<16x32xf32>
    %c0_6 = arith.constant 0 : index
    %c0_7 = arith.constant 0 : index
    %15 = vector.load %arg18[%c0_6, %c0_7] : memref<16x32xf32, #tpu.memory_space<vmem>>, vector<16x32xf32>
    tpu.vector_store %arg18[%c0_6, %c0_7], %14 {strides = array<i32>} : memref<16x32xf32, #tpu.memory_space<vmem>>, vector<16x32xf32>,
    %c0_8 = arith.constant 0 : index
    %c0_9 = arith.constant 0 : index
    %16 = vector.load %arg13[%c0_8, %c0_9] : memref<8x32xf32, #tpu.memory_space<vmem>>, vector<8x32xf32>
    %c0_10 = arith.constant 0 : index
    %c0_11 = arith.constant 0 : index
    %17 = vector.load %arg14[%c0_10, %c0_11] : memref<24x32xf32, #tpu.memory_space<vmem>>, vector<8x32xf32>
    tpu.vector_store %arg14[%c0_10, %c0_11], %16 {strides = array<i32>} : memref<24x32xf32, #tpu.memory_space<vmem>>, vector<8x32xf32>,
    %c8 = arith.constant 8 : index
    %c0_12 = arith.constant 0 : index
    %18 = vector.load %arg14[%c8, %c0_12] : memref<24x32xf32, #tpu.memory_space<vmem>>, vector<16x32xf32>
    tpu.vector_store %arg14[%c8, %c0_12], %7 {strides = array<i32>} : memref<24x32xf32, #tpu.memory_space<vmem>>, vector<16x32xf32>,
    %19 = vector.extract_strided_slice %7 {offsets = [8, 0], sizes = [8, 32], strides = [1, 1]} : vector<16x32xf32> to vector<8x32xf32>
    %c0_13 = arith.constant 0 : index
    %c0_14 = arith.constant 0 : index
    %20 = vector.load %arg13[%c0_13, %c0_14] : memref<8x32xf32, #tpu.memory_space<vmem>>, vector<8x32xf32>
    tpu.vector_store %arg13[%c0_13, %c0_14], %19 {strides = array<i32>} : memref<8x32xf32, #tpu.memory_space<vmem>>, vector<8x32xf32>,
    %c0_15 = arith.constant 0 : index
    %c0_16 = arith.constant 0 : index
    %21 = vector.load %arg4[%c0_15, %c0_16] : memref<4x32xf32, #tpu.memory_space<vmem>>, vector<4x32xf32>
    %c0_17 = arith.constant 0 : index
    %c0_18 = arith.constant 0 : index
    %22 = vector.load %arg5[%c0_17, %c0_18] : memref<1x32xf32, #tpu.memory_space<vmem>>, vector<1x32xf32>
    %c8_19 = arith.constant 8 : index
    %c0_20 = arith.constant 0 : index
    %23 = vector.load %arg14[%c8_19, %c0_20] : memref<24x32xf32, #tpu.memory_space<vmem>>, vector<16x32xf32>
    %24 = vector.extract_strided_slice %21 {offsets = [3, 0], sizes = [1, 32], strides = [1, 1]} : vector<4x32xf32> to vector<1x32xf32>
    %25 = vector.broadcast %24 : vector<1x32xf32> to vector<16x32xf32>
    %26 = arith.mulf %23, %25 : vector<16x32xf32>
    %27 = vector.broadcast %22 : vector<1x32xf32> to vector<16x32xf32>
    %28 = arith.addf %27, %26 : vector<16x32xf32>
    %c7 = arith.constant 7 : index
    %c0_21 = arith.constant 0 : index
    %29 = vector.load %arg14[%c7, %c0_21] : memref<24x32xf32, #tpu.memory_space<vmem>>, vector<16x32xf32>
    %30 = vector.extract_strided_slice %21 {offsets = [2, 0], sizes = [1, 32], strides = [1, 1]} : vector<4x32xf32> to vector<1x32xf32>
    %31 = vector.broadcast %30 : vector<1x32xf32> to vector<16x32xf32>
    %32 = arith.mulf %29, %31 : vector<16x32xf32>
    %33 = arith.addf %28, %32 : vector<16x32xf32>
    %c6 = arith.constant 6 : index
    %c0_22 = arith.constant 0 : index
    %34 = vector.load %arg14[%c6, %c0_22] : memref<24x32xf32, #tpu.memory_space<vmem>>, vector<16x32xf32>
    %35 = vector.extract_strided_slice %21 {offsets = [1, 0], sizes = [1, 32], strides = [1, 1]} : vector<4x32xf32> to vector<1x32xf32>
    %36 = vector.broadcast %35 : vector<1x32xf32> to vector<16x32xf32>
    %37 = arith.mulf %34, %36 : vector<16x32xf32>
    %38 = arith.addf %33, %37 : vector<16x32xf32>
    %c5 = arith.constant 5 : index
    %c0_23 = arith.constant 0 : index
    %39 = vector.load %arg14[%c5, %c0_23] : memref<24x32xf32, #tpu.memory_space<vmem>>, vector<16x32xf32>
    %40 = vector.extract_strided_slice %21 {offsets = [0, 0], sizes = [1, 32], strides = [1, 1]} : vector<4x32xf32> to vector<1x32xf32>
    %41 = vector.broadcast %40 : vector<1x32xf32> to vector<16x32xf32>
    %42 = arith.mulf %39, %41 : vector<16x32xf32>
    %43 = arith.addf %38, %42 : vector<16x32xf32>
    %44 = arith.negf %43 : vector<16x32xf32>
    %45 = math.exp %44 : vector<16x32xf32>
    %cst_24 = arith.constant 1.000000e+00 : f32
    %46 = vector.broadcast %cst_24 : f32 to vector<16x32xf32>
    %47 = arith.addf %46, %45 : vector<16x32xf32>
    %48 = arith.divf %46, %47 : vector<16x32xf32>
    %49 = arith.mulf %43, %48 : vector<16x32xf32>
    %c0_25 = arith.constant 0 : index
    %c0_26 = arith.constant 0 : index
    %50 = vector.load %arg6[%c0_25, %c0_26] : memref<32x128xf32, #tpu.memory_space<vmem>>, vector<32x128xf32>
    %cst_27 = arith.constant dense<0.000000e+00> : vector<16x128xf32>
    %51 = tpu.matmul %49, %50, %cst_27 {dimension_numbers = #tpu.dot_dimension_numbers<[1], [0], [0], [1], [0, 0, 1, 1], [], []>} : vector<16x32xf32>, vector<32x128xf32>, vector<16x128xf32> -> vector<16x128xf32>
    %52 = vector.extract_strided_slice %51 {offsets = [0, 0], sizes = [16, 16], strides = [1, 1]} : vector<16x128xf32> to vector<16x16xf32>
    %c0_28 = arith.constant 0 : index
    %c0_29 = arith.constant 0 : index
    %53 = vector.load %arg19[%c0_28, %c0_29] : memref<16x16xf32, #tpu.memory_space<vmem>>, vector<16x16xf32>
    tpu.vector_store %arg19[%c0_28, %c0_29], %52 {strides = array<i32>} : memref<16x16xf32, #tpu.memory_space<vmem>>, vector<16x16xf32>,
    %54 = vector.extract_strided_slice %51 {offsets = [0, 16], sizes = [16, 16], strides = [1, 1]} : vector<16x128xf32> to vector<16x16xf32>
    %c0_30 = arith.constant 0 : index
    %c0_31 = arith.constant 0 : index
    %55 = vector.load %arg20[%c0_30, %c0_31] : memref<16x16xf32, #tpu.memory_space<vmem>>, vector<16x16xf32>
    tpu.vector_store %arg20[%c0_30, %c0_31], %54 {strides = array<i32>} : memref<16x16xf32, #tpu.memory_space<vmem>>, vector<16x16xf32>,
    %56 = vector.extract_strided_slice %51 {offsets = [0, 32], sizes = [16, 2], strides = [1, 1]} : vector<16x128xf32> to vector<16x2xf32>
    %c0_32 = arith.constant 0 : index
    %c0_33 = arith.constant 0 : index
    %57 = vector.load %arg7[%c0_32, %c0_33] : memref<2x32xf32, #tpu.memory_space<vmem>>, vector<2x32xf32>
    %cst_34 = arith.constant dense<0.000000e+00> : vector<16x32xf32>
    %58 = tpu.matmul %56, %57, %cst_34 {dimension_numbers = #tpu.dot_dimension_numbers<[1], [0], [0], [1], [0, 0, 1, 1], [], []>} : vector<16x2xf32>, vector<2x32xf32>, vector<16x32xf32> -> vector<16x32xf32>
    %c0_35 = arith.constant 0 : index
    %c0_36 = arith.constant 0 : index
    %59 = vector.load %arg9[%c0_35, %c0_36] : memref<1x32xf32, #tpu.memory_space<vmem>>, vector<1x32xf32>
    %60 = vector.broadcast %59 : vector<1x32xf32> to vector<16x32xf32>
    %61 = arith.addf %60, %58 : vector<16x32xf32>
    %cst_37 = arith.constant 0.000000e+00 : f32
    %62 = vector.broadcast %cst_37 : f32 to vector<16x32xf32>
    %63 = arith.maximumf %61, %62 : vector<16x32xf32>
    %64 = vector.broadcast %cst_37 : f32 to vector<16x32xf32>
    %65 = arith.subf %61, %64 : vector<16x32xf32>
    %66 = arith.cmpf one, %65, %65 : vector<16x32xf32>
    %67 = vector.broadcast %cst_37 : f32 to vector<16x32xf32>
    %68 = arith.addf %61, %67 : vector<16x32xf32>
    %69 = math.absf %65 : vector<16x32xf32>
    %cst_38 = arith.constant 0.000000e+00 : f32
    %70 = vector.broadcast %cst_38 : f32 to vector<16x32xf32>
    %71 = arith.subf %70, %69 : vector<16x32xf32>
    %72 = math.exp %71 : vector<16x32xf32>
    %73 = math.log1p %72 : vector<16x32xf32>
    %74 = arith.addf %63, %73 : vector<16x32xf32>
    %75 = arith.select %66, %68, %74 : vector<16x32xi1>, vector<16x32xf32>
    %c0_39 = arith.constant 0 : index
    %c0_40 = arith.constant 0 : index
    %76 = vector.load %arg17[%c0_39, %c0_40] : memref<16x32xf32, #tpu.memory_space<vmem>>, vector<16x32xf32>
    tpu.vector_store %arg17[%c0_39, %c0_40], %75 {strides = array<i32>} : memref<16x32xf32, #tpu.memory_space<vmem>>, vector<16x32xf32>,
    %c0_41 = arith.constant 0 : index
    %c0_42 = arith.constant 0 : index
    %77 = vector.load %arg16[%c0_41, %c0_42] : memref<16x32xf32, #tpu.memory_space<vmem>>, vector<16x32xf32>
    tpu.vector_store %arg16[%c0_41, %c0_42], %49 {strides = array<i32>} : memref<16x32xf32, #tpu.memory_space<vmem>>, vector<16x32xf32>,
    %c0_43 = arith.constant 0 : index
    %c0_44 = arith.constant 0 : index
    %78 = vector.load %arg8[%c0_43, %c0_44] : memref<16x32xf32, #tpu.memory_space<vmem>>, vector<16x32xf32>
    %c0_45 = arith.constant 0 : index
    %c0_46 = arith.constant 0 : index
    %79 = vector.load %arg9[%c0_45, %c0_46] : memref<1x32xf32, #tpu.memory_space<vmem>>, vector<1x32xf32>
    %c0_47 = arith.constant 0 : index
    %c0_48 = arith.constant 0 : index
    %80 = vector.load %arg12[%c0_47, %c0_48] : memref<16x32xf32, #tpu.memory_space<vmem>>, vector<16x32xf32>
    %c0_i32_49 = arith.constant 0 : i32
    %c2_i32 = arith.constant 2 : i32
    %81 = arith.addi %c0_i32_49, %c2_i32 : i32
    %c1_i32 = arith.constant 1 : i32
    %82 = scf.for %arg21 = %c0_i32_49 to %81 step %c1_i32 iter_args(%arg22 = %80) -> (vector<16x32xf32>)  : i32 {
      %c8_i32 = arith.constant 8 : i32
      %90 = arith.muli %arg21, %c8_i32 : i32
      %91 = tpu.assume_multiple %90, 8 : i32
      %92 = arith.index_cast %91 : i32 to index
      %c0_61 = arith.constant 0 : index
      %93 = vector.load %arg19[%92, %c0_61] : memref<16x16xf32, #tpu.memory_space<vmem>>, vector<8x16xf32>
      %94 = tpu.transpose %93, [1, 0] : vector<8x16xf32> -> vector<16x8xf32>
      %95 = arith.index_cast %91 : i32 to index
      %c0_62 = arith.constant 0 : index
      %96 = vector.load %arg20[%95, %c0_62] : memref<16x16xf32, #tpu.memory_space<vmem>>, vector<8x16xf32>
      %97 = tpu.transpose %96, [1, 0] : vector<8x16xf32> -> vector<16x8xf32>
      %98 = arith.index_cast %91 : i32 to index
      %c0_63 = arith.constant 0 : index
      %99 = vector.load %arg17[%98, %c0_63] : memref<16x32xf32, #tpu.memory_space<vmem>>, vector<8x32xf32>
      %100 = arith.index_cast %91 : i32 to index
      %c0_64 = arith.constant 0 : index
      %101 = vector.load %arg16[%100, %c0_64] : memref<16x32xf32, #tpu.memory_space<vmem>>, vector<8x32xf32>
      %102 = arith.index_cast %91 : i32 to index
      %c0_65 = arith.constant 0 : index
      %103 = vector.load %arg18[%102, %c0_65] : memref<16x32xf32, #tpu.memory_space<vmem>>, vector<8x32xf32>
      %104 = vector.extract_strided_slice %99 {offsets = [0, 0], sizes = [1, 32], strides = [1, 1]} : vector<8x32xf32> to vector<1x32xf32>
      %105 = vector.extract_strided_slice %101 {offsets = [0, 0], sizes = [1, 32], strides = [1, 1]} : vector<8x32xf32> to vector<1x32xf32>
      %106 = vector.broadcast %104 : vector<1x32xf32> to vector<16x32xf32>
      %107 = arith.mulf %78, %106 : vector<16x32xf32>
      %108 = arith.mulf %107, %arg22 : vector<16x32xf32>
      %109 = vector.extract_strided_slice %94 {offsets = [0, 0], sizes = [16, 1], strides = [1, 1]} : vector<16x8xf32> to vector<16x1xf32>
      %110 = arith.mulf %104, %105 : vector<1x32xf32>
      %111 = vector.broadcast %109 : vector<16x1xf32> to vector<16x32xf32>
      %112 = vector.broadcast %110 : vector<1x32xf32> to vector<16x32xf32>
      %113 = arith.mulf %111, %112 : vector<16x32xf32>
      %114 = arith.addf %108, %113 : vector<16x32xf32>
      %115 = vector.extract_strided_slice %97 {offsets = [0, 0], sizes = [16, 1], strides = [1, 1]} : vector<16x8xf32> to vector<16x1xf32>
      %116 = vector.broadcast %115 : vector<16x1xf32> to vector<16x32xf32>
      %117 = arith.mulf %116, %114 : vector<16x32xf32>
      %cst_66 = arith.constant dense<0.000000e+00> : vector<32xf32>
      %118 = vector.multi_reduction <add>, %117, %cst_66 [0] : vector<16x32xf32> to vector<32xf32>
      %119 = vector.shape_cast %118 : vector<32xf32> to vector<1x32xf32>
      %120 = arith.mulf %79, %105 : vector<1x32xf32>
      %121 = arith.addf %119, %120 : vector<1x32xf32>
      %122 = vector.extract_strided_slice %99 {offsets = [1, 0], sizes = [1, 32], strides = [1, 1]} : vector<8x32xf32> to vector<1x32xf32>
      %123 = vector.extract_strided_slice %101 {offsets = [1, 0], sizes = [1, 32], strides = [1, 1]} : vector<8x32xf32> to vector<1x32xf32>
      %124 = vector.broadcast %122 : vector<1x32xf32> to vector<16x32xf32>
      %125 = arith.mulf %78, %124 : vector<16x32xf32>
      %126 = arith.mulf %125, %114 : vector<16x32xf32>
      %127 = vector.extract_strided_slice %94 {offsets = [0, 1], sizes = [16, 1], strides = [1, 1]} : vector<16x8xf32> to vector<16x1xf32>
      %128 = arith.mulf %122, %123 : vector<1x32xf32>
      %129 = vector.broadcast %127 : vector<16x1xf32> to vector<16x32xf32>
      %130 = vector.broadcast %128 : vector<1x32xf32> to vector<16x32xf32>
      %131 = arith.mulf %129, %130 : vector<16x32xf32>
      %132 = arith.addf %126, %131 : vector<16x32xf32>
      %133 = vector.extract_strided_slice %97 {offsets = [0, 1], sizes = [16, 1], strides = [1, 1]} : vector<16x8xf32> to vector<16x1xf32>
      %134 = vector.broadcast %133 : vector<16x1xf32> to vector<16x32xf32>
      %135 = arith.mulf %134, %132 : vector<16x32xf32>
      %cst_67 = arith.constant dense<0.000000e+00> : vector<32xf32>
      %136 = vector.multi_reduction <add>, %135, %cst_67 [0] : vector<16x32xf32> to vector<32xf32>
      %137 = vector.shape_cast %136 : vector<32xf32> to vector<1x32xf32>
      %138 = arith.mulf %79, %123 : vector<1x32xf32>
      %139 = arith.addf %137, %138 : vector<1x32xf32>
      %140 = vector.extract_strided_slice %99 {offsets = [2, 0], sizes = [1, 32], strides = [1, 1]} : vector<8x32xf32> to vector<1x32xf32>
      %141 = vector.extract_strided_slice %101 {offsets = [2, 0], sizes = [1, 32], strides = [1, 1]} : vector<8x32xf32> to vector<1x32xf32>
      %142 = vector.broadcast %140 : vector<1x32xf32> to vector<16x32xf32>
      %143 = arith.mulf %78, %142 : vector<16x32xf32>
      %144 = arith.mulf %143, %132 : vector<16x32xf32>
      %145 = vector.extract_strided_slice %94 {offsets = [0, 2], sizes = [16, 1], strides = [1, 1]} : vector<16x8xf32> to vector<16x1xf32>
      %146 = arith.mulf %140, %141 : vector<1x32xf32>
      %147 = vector.broadcast %145 : vector<16x1xf32> to vector<16x32xf32>
      %148 = vector.broadcast %146 : vector<1x32xf32> to vector<16x32xf32>
      %149 = arith.mulf %147, %148 : vector<16x32xf32>
      %150 = arith.addf %144, %149 : vector<16x32xf32>
      %151 = vector.extract_strided_slice %97 {offsets = [0, 2], sizes = [16, 1], strides = [1, 1]} : vector<16x8xf32> to vector<16x1xf32>
      %152 = vector.broadcast %151 : vector<16x1xf32> to vector<16x32xf32>
      %153 = arith.mulf %152, %150 : vector<16x32xf32>
      %cst_68 = arith.constant dense<0.000000e+00> : vector<32xf32>
      %154 = vector.multi_reduction <add>, %153, %cst_68 [0] : vector<16x32xf32> to vector<32xf32>
      %155 = vector.shape_cast %154 : vector<32xf32> to vector<1x32xf32>
      %156 = arith.mulf %79, %141 : vector<1x32xf32>
      %157 = arith.addf %155, %156 : vector<1x32xf32>
      %158 = vector.extract_strided_slice %99 {offsets = [3, 0], sizes = [1, 32], strides = [1, 1]} : vector<8x32xf32> to vector<1x32xf32>
      %159 = vector.extract_strided_slice %101 {offsets = [3, 0], sizes = [1, 32], strides = [1, 1]} : vector<8x32xf32> to vector<1x32xf32>
      %160 = vector.broadcast %158 : vector<1x32xf32> to vector<16x32xf32>
      %161 = arith.mulf %78, %160 : vector<16x32xf32>
      %162 = arith.mulf %161, %150 : vector<16x32xf32>
      %163 = vector.extract_strided_slice %94 {offsets = [0, 3], sizes = [16, 1], strides = [1, 1]} : vector<16x8xf32> to vector<16x1xf32>
      %164 = arith.mulf %158, %159 : vector<1x32xf32>
      %165 = vector.broadcast %163 : vector<16x1xf32> to vector<16x32xf32>
      %166 = vector.broadcast %164 : vector<1x32xf32> to vector<16x32xf32>
      %167 = arith.mulf %165, %166 : vector<16x32xf32>
      %168 = arith.addf %162, %167 : vector<16x32xf32>
      %169 = vector.extract_strided_slice %97 {offsets = [0, 3], sizes = [16, 1], strides = [1, 1]} : vector<16x8xf32> to vector<16x1xf32>
      %170 = vector.broadcast %169 : vector<16x1xf32> to vector<16x32xf32>
      %171 = arith.mulf %170, %168 : vector<16x32xf32>
      %cst_69 = arith.constant dense<0.000000e+00> : vector<32xf32>
      %172 = vector.multi_reduction <add>, %171, %cst_69 [0] : vector<16x32xf32> to vector<32xf32>
      %173 = vector.shape_cast %172 : vector<32xf32> to vector<1x32xf32>
      %174 = arith.mulf %79, %159 : vector<1x32xf32>
      %175 = arith.addf %173, %174 : vector<1x32xf32>
      %176 = vector.extract_strided_slice %99 {offsets = [4, 0], sizes = [1, 32], strides = [1, 1]} : vector<8x32xf32> to vector<1x32xf32>
      %177 = vector.extract_strided_slice %101 {offsets = [4, 0], sizes = [1, 32], strides = [1, 1]} : vector<8x32xf32> to vector<1x32xf32>
      %178 = vector.broadcast %176 : vector<1x32xf32> to vector<16x32xf32>
      %179 = arith.mulf %78, %178 : vector<16x32xf32>
      %180 = arith.mulf %179, %168 : vector<16x32xf32>
      %181 = vector.extract_strided_slice %94 {offsets = [0, 4], sizes = [16, 1], strides = [1, 1]} : vector<16x8xf32> to vector<16x1xf32>
      %182 = arith.mulf %176, %177 : vector<1x32xf32>
      %183 = vector.broadcast %181 : vector<16x1xf32> to vector<16x32xf32>
      %184 = vector.broadcast %182 : vector<1x32xf32> to vector<16x32xf32>
      %185 = arith.mulf %183, %184 : vector<16x32xf32>
      %186 = arith.addf %180, %185 : vector<16x32xf32>
      %187 = vector.extract_strided_slice %97 {offsets = [0, 4], sizes = [16, 1], strides = [1, 1]} : vector<16x8xf32> to vector<16x1xf32>
      %188 = vector.broadcast %187 : vector<16x1xf32> to vector<16x32xf32>
      %189 = arith.mulf %188, %186 : vector<16x32xf32>
      %cst_70 = arith.constant dense<0.000000e+00> : vector<32xf32>
      %190 = vector.multi_reduction <add>, %189, %cst_70 [0] : vector<16x32xf32> to vector<32xf32>
      %191 = vector.shape_cast %190 : vector<32xf32> to vector<1x32xf32>
      %192 = arith.mulf %79, %177 : vector<1x32xf32>
      %193 = arith.addf %191, %192 : vector<1x32xf32>
      %194 = vector.extract_strided_slice %99 {offsets = [5, 0], sizes = [1, 32], strides = [1, 1]} : vector<8x32xf32> to vector<1x32xf32>
      %195 = vector.extract_strided_slice %101 {offsets = [5, 0], sizes = [1, 32], strides = [1, 1]} : vector<8x32xf32> to vector<1x32xf32>
      %196 = vector.broadcast %194 : vector<1x32xf32> to vector<16x32xf32>
      %197 = arith.mulf %78, %196 : vector<16x32xf32>
      %198 = arith.mulf %197, %186 : vector<16x32xf32>
      %199 = vector.extract_strided_slice %94 {offsets = [0, 5], sizes = [16, 1], strides = [1, 1]} : vector<16x8xf32> to vector<16x1xf32>
      %200 = arith.mulf %194, %195 : vector<1x32xf32>
      %201 = vector.broadcast %199 : vector<16x1xf32> to vector<16x32xf32>
      %202 = vector.broadcast %200 : vector<1x32xf32> to vector<16x32xf32>
      %203 = arith.mulf %201, %202 : vector<16x32xf32>
      %204 = arith.addf %198, %203 : vector<16x32xf32>
      %205 = vector.extract_strided_slice %97 {offsets = [0, 5], sizes = [16, 1], strides = [1, 1]} : vector<16x8xf32> to vector<16x1xf32>
      %206 = vector.broadcast %205 : vector<16x1xf32> to vector<16x32xf32>
      %207 = arith.mulf %206, %204 : vector<16x32xf32>
      %cst_71 = arith.constant dense<0.000000e+00> : vector<32xf32>
      %208 = vector.multi_reduction <add>, %207, %cst_71 [0] : vector<16x32xf32> to vector<32xf32>
      %209 = vector.shape_cast %208 : vector<32xf32> to vector<1x32xf32>
      %210 = arith.mulf %79, %195 : vector<1x32xf32>
      %211 = arith.addf %209, %210 : vector<1x32xf32>
      %212 = vector.extract_strided_slice %99 {offsets = [6, 0], sizes = [1, 32], strides = [1, 1]} : vector<8x32xf32> to vector<1x32xf32>
      %213 = vector.extract_strided_slice %101 {offsets = [6, 0], sizes = [1, 32], strides = [1, 1]} : vector<8x32xf32> to vector<1x32xf32>
      %214 = vector.broadcast %212 : vector<1x32xf32> to vector<16x32xf32>
      %215 = arith.mulf %78, %214 : vector<16x32xf32>
      %216 = arith.mulf %215, %204 : vector<16x32xf32>
      %217 = vector.extract_strided_slice %94 {offsets = [0, 6], sizes = [16, 1], strides = [1, 1]} : vector<16x8xf32> to vector<16x1xf32>
      %218 = arith.mulf %212, %213 : vector<1x32xf32>
      %219 = vector.broadcast %217 : vector<16x1xf32> to vector<16x32xf32>
      %220 = vector.broadcast %218 : vector<1x32xf32> to vector<16x32xf32>
      %221 = arith.mulf %219, %220 : vector<16x32xf32>
      %222 = arith.addf %216, %221 : vector<16x32xf32>
      %223 = vector.extract_strided_slice %97 {offsets = [0, 6], sizes = [16, 1], strides = [1, 1]} : vector<16x8xf32> to vector<16x1xf32>
      %224 = vector.broadcast %223 : vector<16x1xf32> to vector<16x32xf32>
      %225 = arith.mulf %224, %222 : vector<16x32xf32>
      %cst_72 = arith.constant dense<0.000000e+00> : vector<32xf32>
      %226 = vector.multi_reduction <add>, %225, %cst_72 [0] : vector<16x32xf32> to vector<32xf32>
      %227 = vector.shape_cast %226 : vector<32xf32> to vector<1x32xf32>
      %228 = arith.mulf %79, %213 : vector<1x32xf32>
      %229 = arith.addf %227, %228 : vector<1x32xf32>
      %230 = vector.extract_strided_slice %99 {offsets = [7, 0], sizes = [1, 32], strides = [1, 1]} : vector<8x32xf32> to vector<1x32xf32>
      %231 = vector.extract_strided_slice %101 {offsets = [7, 0], sizes = [1, 32], strides = [1, 1]} : vector<8x32xf32> to vector<1x32xf32>
      %232 = vector.broadcast %230 : vector<1x32xf32> to vector<16x32xf32>
      %233 = arith.mulf %78, %232 : vector<16x32xf32>
      %234 = arith.mulf %233, %222 : vector<16x32xf32>
      %235 = vector.extract_strided_slice %94 {offsets = [0, 7], sizes = [16, 1], strides = [1, 1]} : vector<16x8xf32> to vector<16x1xf32>
      %236 = arith.mulf %230, %231 : vector<1x32xf32>
      %237 = vector.broadcast %235 : vector<16x1xf32> to vector<16x32xf32>
      %238 = vector.broadcast %236 : vector<1x32xf32> to vector<16x32xf32>
      %239 = arith.mulf %237, %238 : vector<16x32xf32>
      %240 = arith.addf %234, %239 : vector<16x32xf32>
      %241 = vector.extract_strided_slice %97 {offsets = [0, 7], sizes = [16, 1], strides = [1, 1]} : vector<16x8xf32> to vector<16x1xf32>
      %242 = vector.broadcast %241 : vector<16x1xf32> to vector<16x32xf32>
      %243 = arith.mulf %242, %240 : vector<16x32xf32>
      %cst_73 = arith.constant dense<0.000000e+00> : vector<32xf32>
      %244 = vector.multi_reduction <add>, %243, %cst_73 [0] : vector<16x32xf32> to vector<32xf32>
      %245 = vector.shape_cast %244 : vector<32xf32> to vector<1x32xf32>
      %246 = arith.mulf %79, %231 : vector<1x32xf32>
      %247 = arith.addf %245, %246 : vector<1x32xf32>
      %248 = tpu.concatenate %121, %139, %157, %175, %193, %211, %229, %247 in 0 : vector<1x32xf32>, vector<1x32xf32>, vector<1x32xf32>, vector<1x32xf32>, vector<1x32xf32>, vector<1x32xf32>, vector<1x32xf32>, vector<1x32xf32> -> vector<8x32xf32>
      %249 = arith.mulf %248, %103 : vector<8x32xf32>
      %250 = arith.index_cast %91 : i32 to index
      %c0_74 = arith.constant 0 : index
      %251 = vector.load %arg15[%250, %c0_74] : memref<16x32xf32, #tpu.memory_space<vmem>>, vector<8x32xf32>
      tpu.vector_store %arg15[%250, %c0_74], %249 {strides = array<i32>} : memref<16x32xf32, #tpu.memory_space<vmem>>, vector<8x32xf32>,
      scf.yield %240 : vector<16x32xf32>
    }
    %c2_i32_50 = arith.constant 2 : i32
    %c0_51 = arith.constant 0 : index
    %c0_52 = arith.constant 0 : index
    %83 = vector.load %arg12[%c0_51, %c0_52] : memref<16x32xf32, #tpu.memory_space<vmem>>, vector<16x32xf32>
    tpu.vector_store %arg12[%c0_51, %c0_52], %82 {strides = array<i32>} : memref<16x32xf32, #tpu.memory_space<vmem>>, vector<16x32xf32>,
    %c0_53 = arith.constant 0 : index
    %c0_54 = arith.constant 0 : index
    %84 = vector.load %arg15[%c0_53, %c0_54] : memref<16x32xf32, #tpu.memory_space<vmem>>, vector<16x32xf32>
    %c0_55 = arith.constant 0 : index
    %c0_56 = arith.constant 0 : index
    %85 = vector.load %arg10[%c0_55, %c0_56] : memref<32x8xf32, #tpu.memory_space<vmem>>, vector<32x8xf32>
    %cst_57 = arith.constant dense<0.000000e+00> : vector<16x8xf32>
    %86 = tpu.matmul %84, %85, %cst_57 {dimension_numbers = #tpu.dot_dimension_numbers<[1], [0], [0], [1], [0, 0, 1, 1], [], []>} : vector<16x32xf32>, vector<32x8xf32>, vector<16x8xf32> -> vector<16x8xf32>
    %c0_58 = arith.constant 0 : index
    %c0_59 = arith.constant 0 : index
    %c0_60 = arith.constant 0 : index
    %87 = vector.load %arg11[%c0_58, %c0_59, %c0_60] : memref<1x16x8xf32, #tpu.memory_space<vmem>>, vector<1x16x8xf32>
    %88 = vector.shape_cast %87 : vector<1x16x8xf32> to vector<16x8xf32>
    %89 = vector.shape_cast %86 : vector<16x8xf32> to vector<1x16x8xf32>
    tpu.vector_store %arg11[%c0_58, %c0_59, %c0_60], %89 {strides = array<i32>} : memref<1x16x8xf32, #tpu.memory_space<vmem>>, vector<1x16x8xf32>,
    return
  }
  func.func @transform_0(%arg0: i32, %arg1: i32) -> (i32, i32, i32) {
    %c0_i32 = arith.constant 0 : i32
    %c0_i32_0 = arith.constant 0 : i32
    return %arg0, %arg1, %c0_i32 : i32, i32, i32
  }
  func.func @transform_1(%arg0: i32, %arg1: i32) -> (i32, i32) {
    %c0_i32 = arith.constant 0 : i32
    %c0_i32_0 = arith.constant 0 : i32
    %c0_i32_1 = arith.constant 0 : i32
    return %c0_i32, %c0_i32_0 : i32, i32
  }
  func.func @transform_2(%arg0: i32, %arg1: i32) -> (i32, i32) {
    %c0_i32 = arith.constant 0 : i32
    %c0_i32_0 = arith.constant 0 : i32
    %c0_i32_1 = arith.constant 0 : i32
    return %c0_i32, %c0_i32_0 : i32, i32
  }
  func.func @transform_3(%arg0: i32, %arg1: i32) -> (i32, i32) {
    %c0_i32 = arith.constant 0 : i32
    %c0_i32_0 = arith.constant 0 : i32
    %c0_i32_1 = arith.constant 0 : i32
    return %c0_i32, %c0_i32_0 : i32, i32
  }
  func.func @transform_4(%arg0: i32, %arg1: i32) -> (i32, i32) {
    %c0_i32 = arith.constant 0 : i32
    %c0_i32_0 = arith.constant 0 : i32
    %c0_i32_1 = arith.constant 0 : i32
    return %c0_i32, %c0_i32_0 : i32, i32
  }
  func.func @transform_5(%arg0: i32, %arg1: i32) -> (i32, i32) {
    %c0_i32 = arith.constant 0 : i32
    %c0_i32_0 = arith.constant 0 : i32
    %c0_i32_1 = arith.constant 0 : i32
    return %c0_i32, %c0_i32_0 : i32, i32
  }
  func.func @transform_6(%arg0: i32, %arg1: i32) -> (i32, i32) {
    %c0_i32 = arith.constant 0 : i32
    %c0_i32_0 = arith.constant 0 : i32
    %c0_i32_1 = arith.constant 0 : i32
    return %c0_i32, %c0_i32_0 : i32, i32
  }
  func.func @transform_7(%arg0: i32, %arg1: i32) -> (i32, i32) {
    %c0_i32 = arith.constant 0 : i32
    %c0_i32_0 = arith.constant 0 : i32
    %c0_i32_1 = arith.constant 0 : i32
    return %c0_i32, %c0_i32_0 : i32, i32
  }
  func.func @transform_8(%arg0: i32, %arg1: i32) -> (i32, i32) {
    %c0_i32 = arith.constant 0 : i32
    %c0_i32_0 = arith.constant 0 : i32
    %c0_i32_1 = arith.constant 0 : i32
    return %c0_i32, %c0_i32_0 : i32, i32
  }
  func.func @transform_9(%arg0: i32, %arg1: i32) -> (i32, i32, i32) {
    %c0_i32 = arith.constant 0 : i32
    %c0_i32_0 = arith.constant 0 : i32
    return %arg0, %arg1, %c0_i32 : i32, i32, i32
  }
}

</mosaic_0001>

<bundles_post_ra>
// kernel: tpu_custom_call.1
= control target key start
LH: loop header
LB: loop body
LE: loop exit
PB: predicated region body
PF: predicated region fallthrough
CT: control target
= control target key end

     0   :  { %s1882_s30 = smov 0   ;;  %s1884_s10 = smov 0   ;;  %s2214_s0 = inlined_call_operand.vmem [shape: f32[2,32,8], index: 0, kind: input, shape index: {}]   ;;  %s2215_s1 = inlined_call_operand.vmem [shape: f32[8,64], index: 1, kind: input, shape index: {}]   ;;  %s2216_s2 = inlined_call_operand.vmem [shape: f32[4,32], index: 2, kind: input, shape index: {}]   ;;  %s2217_s3 = inlined_call_operand.vmem [shape: f32[1,32], index: 3, kind: input, shape index: {}]   ;;  %s2218_s4 = inlined_call_operand.vmem [shape: f32[32,128], index: 4, kind: input, shape index: {}]   ;;  %s2219_s5 = inlined_call_operand.vmem [shape: f32[2,32], index: 5, kind: input, shape index: {}]   ;;  %s2220_s6 = inlined_call_operand.vmem [shape: f32[16,32], index: 6, kind: input, shape index: {}]   ;;  %s2221_s7 = inlined_call_operand.vmem [shape: f32[1,32], index: 7, kind: input, shape index: {}]   ;;  %s2222_s8 = inlined_call_operand.vmem [shape: f32[32,8], index: 8, kind: input, shape index: {}]   ;;  %s2223_s9 = inlined_call_operand.vmem [shape: f32[2,32,8], index: 9, kind: output, shape index: {}]  }
   0x1   :  { %s1886_s11 = smov 0   ;;  %s1888_s12 = smov 0  }
   0x2   :  { %s1890_s13 = smov 0  }
   0x3 LB: > { %s28_s14 = sadd.s32 1, %s1798_s11  ;;  %s31_s15 = sadd.s32 1, %s1802_s12  ;;  %s1806_s13 = sphi %s1890_s13, %s19_s13   ;;  %s1802_s12 = sphi %s1888_s12, %s2230_s12   ;;  %s1798_s11 = sphi %s1886_s11, %s2229_s11   ;;  %s1794_s10 = sphi %s1884_s10, %s2228_s10   ;;  %s1790_s30 = sphi %s1882_s30, %s2227_s30  }
   0x4   : > { %p29_p0 = scmp.ge.s32.totalorder %s28_s14, 2  ;;  %p1548_p1 = scmp.ge.s32.totalorder %s1806_s13, 1 }
   0x5   : > { %p308_p2 = scmp.lt.s32.totalorder %s1806_s13, 5 }
   0x6   : > { %s2232_s14 = smov (%p29_p0, %s28_s14), 0  ;;  %s2234_s15 = smov (!%p29_p0, %s31_s15), %s1802_s12 }
   0x7   : > { %p309_p3 = pnand %p1548_p1, %p308_p2  ;;  %p33_p4 = scmp.ge.s32.totalorder %s2234_s15, 2 }
   0x8   : > { %s1549_s16 = sshll.u32 (!%p309_p3), %s1790_s30, 1  ;;  %p353_p5 = scmp.lt.s32.totalorder (!%p309_p3), %s1794_s10, 1 }
   0x9   : > { %s2236_s15 = smov (%p33_p4, %s2234_s15), 0  ;;  %312 = sbr.rel (%p309_p3) target bundleno = 1431 (0x597), region = 56 }
   0xa   : > { %p355_p6 = scmp.lt.s32.totalorder (!%p309_p3), %s1549_s16, 3  ;;  %p1555_p7 = scmp.ne.s32.totalorder (!%p309_p3), %s1790_s30, 0 }
   0xe   : > { %s2238_s10 = smov (!%p353_p5, %s1794_s10), 1  ;;  %s2240_s16 = smov (!%p355_p6, %s1549_s16), 3 }
   0xf   : > { %s1550_s17 = sshll.u32 %s2238_s10, 2  ;;  %375 = sbr.rel (%p1555_p7) target bundleno = 23 (0x17), region = 60 }
  0x10   : > { %s358_s18 = sadd.s32 %s1550_s17, %s2240_s16 }
  0x11   : > { %s1551_s19 = sshll.u32 %s358_s18, 3 }
  0x12   : > { %s360_s22 = scalar_lea.vmem %s2214_s0, %s1551_s19  ;;  %s1918_s25 = scalar_lea.vmem %s2223_s9, %s1551_s19 }
  0x14   : > { %vm376_vm0 = vcmask 261120   ;;  %v1820_v0 = vmov 0.0  }
  0x15   : > { %377 = vst.msk [vmem:[#allocation2] sm:$0xff] %vm376_vm0, %v1820_v0  ;;  %378 = vst.msk [vmem:[#allocation2 + $0x8] sm:$0xff] %vm376_vm0, %v1820_v0 }
  0x16   : > { %379 = vst.msk [vmem:[#allocation3] sm:$0xff] %vm376_vm0, %v1820_v0 }
  0x17 PF: > { %v382_v1 = vld [vmem:[%s2215_s1] sm:$0xff]  ;;  %vm383_vm1 = vcmask 64512   ;;  %v381_v3 = vld [vmem:[%s360_s22 + $0x8] sm:$0xff]  ;;  %vm487_vm2 = vcmask 261120   ;;  %v560_v5 = vld [vmem:[%s2218_s4 + $0x18] sm:$0xff]  ;;  %v499_v9 = vlaneseq  ;;  %s1821_s24 = smov 96  }
  0x18   : > { %v380_v2 = vld [vmem:[%s360_s22] sm:$0xff]  ;;  %1592 = vmatprep.subr.mxu1 %v382_v1  ;;  %v559_v6 = vld [vmem:[%s2218_s4 + $0x10] sm:$0xff]  ;;  %v558_v7 = vld [vmem:[%s2218_s4 + $0x8] sm:$0xff]  ;;  %vm665_vm3 = vcmask 1041408   ;;  %vm642_vm4 = vcmask 130048   ;;  %s1822_s28 = smov 112  }
  0x19   : > { %1594 = vmatprep.mubr.msk.f32.mxu1 %vm383_vm1, %v380_v2  ;;  %1593 = vmatpush3.msra.mxu1 %v382_v1  ;;  %v557_v8 = vld [vmem:[%s2218_s4] sm:$0xff]  ;;  %v1938_v10 = vshrl.u32 %v499_v9, 7  ;;  %vm660_vm5 = vcmask 15360   ;;  %s2014_s21 = smov 0  }
  0x1a   : > { %1595 = vmatmul.mubr.msk.f32.vlgmr.msra.gmra.mxu1 %vm383_vm1, %v381_v3  ;;  %1597 = vmatprep.subr.mxu1 %v560_v5  ;;  %v495_v15 = vld [vmem:[%s2216_s2] sm:$0xf] }
  0x1b   : > { %1598 = vmatpush3.msra.mxu1 %v560_v5  ;;  %v1948_v13 = vsub.s32 3, %v1938_v10  ;;  %v1955_v17 = vsub.s32 2, %v1938_v10  ;;  %v1959_v19 = vsub.s32 1, %v1938_v10  ;;  %v1963_v21 = vsub.s32 0, %v1938_v10  ;;  %v1560_v22 = vld [vmem:[%s2217_s3] ss:$0 sm:$0xff] }
  0x1c   : > { %1599 = vmatprep.subr.mxu1 %v559_v6  ;;  %v655_v5 = vld [vmem:[%s2219_s5] sm:$0x3] }
  0x1d   : > { %v490_v4 = vld [vmem:[#allocation3] sm:$0xff]  ;;  %1600 = vmatpush3.msra.mxu1 %v559_v6  ;;  %v502_v18 = vrot.slane %v495_v15, %v1948_v13  ;;  %v518_v20 = vrot.slane %v495_v15, %v1955_v17  ;;  %v528_v25 = vrot.slane %v495_v15, %v1959_v19  ;;  %v538_v33 = vrot.slane %v495_v15, %v1963_v21  ;;  %v1998_v15 = vld [vmem:[%s2220_s6 + $0x8] sm:$0xff] }
  0x1e   : > { %491 = vst.msk [vmem:[#allocation4] sm:$0xff] %vm487_vm2, %v490_v4  ;;  %1601 = vmatprep.subr.mxu1 %v558_v7  ;;  %1608 = vmatprep.subr.msk.mxu0 %vm665_vm3, %v655_v5 }
  0x1f   : > { %1602 = vmatpush3.msra.mxu1 %v558_v7  ;;  %1609 = vmatpush3.msk.msra.mxu0 %vm665_vm3, %v655_v5 }
  0x20   : > { %1603 = vmatprep.subr.mxu1 %v557_v8 }
  0x21   : > { %1604 = vmatpush3.msra.mxu1 %v557_v8 }
  0xda   : > { %v1940_v11 = vpop.f32.mrf.mxu1 }
  0xdb   : > { %v1559_v12 = vmul.f32 -1.442695, %v1940_v11  ;;  %493 = vst.msk [vmem:[#allocation4 + $0x10] sm:$0xff] %vm487_vm2, %v1940_v11  ;;  %494 = vst.msk [vmem:[#allocation3] sm:$0xff] %vm487_vm2, %v1940_v11 }
  0xdc   : > { %v456_v14 = vpop.f32.mrf.mxu1 }
  0xdd   : > { %1701 = vpow2.f32 %v1559_v12  ;;  %v1558_v16 = vmul.f32 -1.442695, %v456_v14  ;;  %492 = vst.msk [vmem:[#allocation4 + $0x8] sm:$0xff] %vm487_vm2, %v456_v14 }
  0xdf   : > { %1703 = vpow2.f32 %v1558_v16  ;;  %v2003_v16 = vld [vmem:[%s2221_s7] sm:$0x1] }
  0xe2   : > { %v498_v23 = vld [vmem:[#allocation4 + $0x10] sm:$0xff] }
  0xe3   : > { %v504_v24 = vmul.f32 %v502_v18, %v498_v23 }
  0xe4   : > { %v497_v26 = vld [vmem:[#allocation4 + $0x8] sm:$0xff] }
  0xe5   : > { %v513_v27 = vld [vmem:[#allocation4 + $0x7] sm:$0xff]  ;;  %v514_v28 = vld [vmem:[#allocation4 + $0xf] sm:$0xff]  ;;  %v503_v29 = vmul.f32 %v502_v18, %v497_v26  ;;  %v512_v30 = vadd.f32 %v1560_v22, %v504_v24 }
  0xe6   : > { %v520_v31 = vmul.f32 %v518_v20, %v514_v28  ;;  %v524_v32 = vld [vmem:[#allocation4 + $0xe] sm:$0xff]  ;;  %v523_v34 = vld [vmem:[#allocation4 + $0x6] sm:$0xff]  ;;  %v519_v37 = vmul.f32 %v518_v20, %v513_v27 }
  0xe7   : > { %v534_v35 = vld [vmem:[#allocation4 + $0xd] sm:$0xff]  ;;  %v511_v36 = vadd.f32 %v1560_v22, %v503_v29  ;;  %v530_v38 = vmul.f32 %v528_v25, %v524_v32  ;;  %v533_v40 = vld [vmem:[#allocation4 + $0x5] sm:$0xff]  ;;  %v529_v42 = vmul.f32 %v528_v25, %v523_v34 }
  0xe8   : > { %v522_v39 = vadd.f32 %v520_v31, %v512_v30  ;;  %v540_v43 = vmul.f32 %v538_v33, %v534_v35  ;;  %v539_v48 = vmul.f32 %v538_v33, %v533_v40  ;;  %v796_v18 = vld [vmem:[#allocation2] sm:$0xff]   ;;  %v797_v20 = vld [vmem:[#allocation2 + $0x8] sm:$0xff]  }
  0xe9   : > { %v521_v41 = vadd.f32 %v519_v37, %v511_v36  ;;  %v1568_v22 = vld [vmem:[%s2221_s7] ss:$0 sm:$0xff] }
  0xea   : > { %v532_v44 = vadd.f32 %v530_v38, %v522_v39  ;;  %v1702_v45 = vpop.eup %1701 }
  0xeb   : > { %v472_v46 = vadd.f32 1.0, %v1702_v45  ;;  %v531_v47 = vadd.f32 %v529_v42, %v521_v41 }
  0xec   : > { %v542_v49 = vadd.f32 %v540_v43, %v532_v44  ;;  %v1704_v50 = vpop.eup %1703 }
  0xed   : > { %v471_v51 = vadd.f32 1.0, %v1704_v50  ;;  %v541_v52 = vadd.f32 %v539_v48, %v531_v47  ;;  %1705 = vrcp.f32 %v472_v46 }
  0xee   : > { %v1562_v53 = vmul.f32 -1.442695, %v542_v49 }
  0xef   : > { %1707 = vrcp.f32 %v471_v51  ;;  %v1561_v54 = vmul.f32 -1.442695, %v541_v52 }
  0xf0   : > { %1709 = vpow2.f32 %v1562_v53 }
  0xf1   : > { %1711 = vpow2.f32 %v1561_v54 }
  0xfa   : > { %v1706_v55 = vpop.eup %1705 }
  0xfb   : > { %v478_v62 = vmul.f32 %v1706_v55, %v1940_v11 }
  0xfc   : > { %v1708_v56 = vpop.eup %1707 }
  0xfd   : > { %v1710_v57 = vpop.eup %1709  ;;  %v477_v58 = vmul.f32 %v1708_v56, %v456_v14  ;;  %v1993_v14 = vld [vmem:[%s2220_s6] sm:$0xff] }
  0xfe   : > { %v1712_v59 = vpop.eup %1711  ;;  %v550_v60 = vadd.f32 1.0, %v1710_v57 }
  0xff   : > { %481 = vrot.lane.b32.xlu1 %v477_v58, %s1821_s24  ;;  %v549_v61 = vadd.f32 1.0, %v1712_v59 }
 0x100   : > { %1713 = vrcp.f32 %v550_v60 }
 0x101   : > { %1715 = vrcp.f32 %v549_v61 }
 0x103   : > { %483 = vrot.lane.b32.xlu1 %v478_v62, %s1821_s24 }
 0x10d   : > { %v1714_v63 = vpop.eup %1713 }
 0x10e   : > { %v1716_v0 = vpop.eup %1715  ;;  %v556_v1 = vmul.f32 %v1714_v63, %v542_v49 }
 0x10f   : > { %v555_v2 = vmul.f32 %v1716_v0, %v541_v52 }
 0x110   : > { %792 = vst.msk [vmem:[#allocation6 + $0x8] sm:$0xff] %vm487_vm2, %v556_v1 }
 0x111   : > { %1605 = vmatprep.mubr.msk.f32.mxu1 %vm487_vm2, %v555_v2  ;;  %791 = vst.msk [vmem:[#allocation6] sm:$0xff] %vm487_vm2, %v555_v2 }
 0x112   : > { %1606 = vmatmul.mubr.msk.f32.vlgmr.msra.gmra.mxu1 %vm487_vm2, %v556_v1 }
 0x171   : > { %v482_v3 = vpop.permute.xlu1 %481 }
 0x172   : > { %488 = vst.msk [vmem:[#allocation8] sm:$0xff] %vm487_vm2, %v482_v3 }
 0x175   : > { %v484_v4 = vpop.permute.xlu1 %483 }
 0x176   : > { %489 = vst.msk [vmem:[#allocation8 + $0x8] sm:$0xff] %vm487_vm2, %v484_v4 }
 0x1d2   : > { %v1607_v6 = vpop.f32.mrf.mxu1 }
 0x1d3   : > { %644 = vst.msk [vmem:[#allocation9 + $0x8] sm:$0xff] %vm642_vm4, %v1607_v6  ;;  %649 = vrot.lane.b32.xlu1 %v1607_v6, %s1822_s28 }
 0x1d4   : > { %v633_v7 = vpop.f32.mrf.mxu1 }
 0x1d5   : > { %643 = vst.msk [vmem:[#allocation9] sm:$0xff] %vm642_vm4, %v633_v7  ;;  %656 = vrot.lane.b32.xlu0 %v633_v7, %s1821_s24 }
 0x1d9   : > { %658 = vrot.lane.b32.xlu0 %v1607_v6, %s1821_s24 }
 0x1dd   : > { %647 = vrot.lane.b32.xlu0 %v633_v7, %s1822_s28 }
 0x245   : > { %v650_v8 = vpop.permute.xlu1 %649 }
 0x246   : > { %654 = vst.msk [vmem:[#allocation10 + $0x8] sm:$0xff] %vm642_vm4, %v650_v8 }
 0x247   : > { %v657_v9 = vpop.permute.xlu0 %656 }
 0x248   : > { %1610 = vmatprep.mubr.msk.f32.mxu0 %vm660_vm5, %v657_v9 }
 0x24b   : > { %v659_v11 = vpop.permute.xlu0 %658 }
 0x24c   : > { %1611 = vmatmul.mubr.msk.f32.vlgmr.msra.gmra.mxu0 %vm660_vm5, %v659_v11 }
 0x24f   : > { %v648_v12 = vpop.permute.xlu0 %647 }
 0x250   : > { %653 = vst.msk [vmem:[#allocation10] sm:$0xff] %vm642_vm4, %v648_v12 }
 0x30c   : > { %v1612_v23 = vpop.f32.mrf.mxu0 }
 0x30d   : > { %v752_v24 = vadd.f32 %v1612_v23, %v1568_v22 }
 0x30e   : > { %v735_v25 = vpop.f32.mrf.mxu0 }
 0x30f   : > { %v760_v26 = vand.u32 2147483647, %v752_v24  ;;  %v751_v27 = vadd.f32 %v1568_v22, %v735_v25  ;;  %v754_v47 = vmax.f32 %v752_v24, 0.0  ;;  %vm756_vm8 = vcmp.ne.f32.partialorder %v752_v24, %v752_v24 }
 0x311   : > { %v762_v28 = vsub.f32 0.0, %v760_v26  ;;  %v759_v29 = vand.u32 2147483647, %v751_v27  ;;  %v753_v52 = vmax.f32 %v751_v27, 0.0  ;;  %vm755_vm9 = vcmp.ne.f32.partialorder %v751_v27, %v751_v27 }
 0x313   : > { %v765_v30 = vmul.f32 1.442695, %v762_v28  ;;  %v761_v31 = vsub.f32 0.0, %v759_v29 }
 0x315   : > { %1717 = vpow2.f32 %v765_v30  ;;  %v763_v32 = vmul.f32 1.442695, %v761_v31 }
 0x317   : > { %1719 = vpow2.f32 %v763_v32 }
 0x322   : > { %v1718_v33 = vpop.eup %1717 }
 0x323   : > { %v776_v34 = vadd.f32 1.0, %v1718_v33  ;;  %v779_v37 = vmul.f32 -0.5, %v1718_v33  ;;  %v782_v40 = vand.u32 2147483647, %v1718_v33 }
 0x324   : > { %v1720_v35 = vpop.eup %1719 }
 0x325   : > { %1721 = vlog2.f32 %v776_v34  ;;  %v767_v36 = vadd.f32 1.0, %v1720_v35  ;;  %v770_v38 = vmul.f32 -0.5, %v1720_v35  ;;  %v780_v39 = vadd.f32 1.0, %v779_v37 }
 0x326   : > { %v773_v43 = vand.u32 2147483647, %v1720_v35  ;;  %vm783_vm6 = vcmp.lt.f32.partialorder %v782_v40, 0.0004427343 }
 0x327   : > { %1723 = vlog2.f32 %v767_v36  ;;  %v771_v41 = vadd.f32 1.0, %v770_v38  ;;  %v781_v45 = vmul.f32 %v1718_v33, %v780_v39 }
 0x328   : > { %vm774_vm7 = vcmp.lt.f32.partialorder %v773_v43, 0.0004427343 }
 0x329   : > { %v772_v50 = vmul.f32 %v1720_v35, %v771_v41 }
 0x332   : > { %v1722_v42 = vpop.eup %1721 }
 0x333   : > { %v778_v44 = vmul.f32 0.6931472, %v1722_v42 }
 0x334   : > { %v1724_v46 = vpop.eup %1723 }
 0x335   : > { %v784_v48 = vsel %vm783_vm6, %v781_v45, %v778_v44  ;;  %v769_v49 = vmul.f32 0.6931472, %v1724_v46 }
 0x336   : > { %v786_v51 = vadd.f32 %v784_v48, %v754_v47 }
 0x337   : > { %v775_v53 = vsel %vm774_vm7, %v772_v50, %v769_v49 }
 0x338   : > { %v788_v54 = vsel %vm756_vm8, %v752_v24, %v786_v51  ;;  %v785_v55 = vadd.f32 %v775_v53, %v753_v52 }
 0x339   : > { %790 = vst.msk [vmem:[#allocation7 + $0x8] sm:$0xff] %vm487_vm2, %v788_v54 }
 0x33a   : > { %v787_v56 = vsel %vm755_vm9, %v751_v27, %v785_v55 }
 0x33b   : > { %789 = vst.msk [vmem:[#allocation7] sm:$0xff] %vm487_vm2, %v787_v56 }
 0x33c LB: >> { %v1823_v57 = vmov 0   ;;  %s2026_s22 = sshll.u32 %s1818_s21, 3  ;;  %v1824_v60 = vmov 2   ;;  %v1825_v1 = vmov 1   ;;  %v1826_v2 = vmov 6   ;;  %s803_s21 = sadd.s32 1, %s1818_s21   ;;  %s1818_s21 = sphi %s2014_s21, %s803_s21   ;;  %v1814_v18 = vphi %v796_v18, %v2226_v18   ;;  %v1810_v20 = vphi %v797_v20, %v2225_v20  }
 0x33d   : >> { %1725 = vset.pattern.permute.xlu1 %v1823_v57  ;;  %s807_s23 = scalar_lea.vmem [#allocation9], %s2026_s22  ;;  %s841_s24 = scalar_lea.vmem [#allocation10], %s2026_s22  ;;  %v1827_v3 = vmov 3   ;;  %v1828_v4 = vmov 4   ;;  %v1829_v5 = vmov 5   ;;  %v1830_v6 = vmov 7  }
 0x33e   : >> { %v808_v58 = vld [vmem:[%s807_s23] sm:$0xff]  ;;  %s875_s26 = scalar_lea.vmem [#allocation7], %s2026_s22  ;;  %s877_s27 = scalar_lea.vmem [#allocation6], %s2026_s22  ;;  %vm1324_vm10 = vcmask 1040384   ;;  %vm1327_vm11 = vcmask 1042432   ;;  %vm1329_vm12 = vcmask 1043456  }
 0x33f   : >> { %809 = vxpose.xlu0.b32.start.end [1/1] (short) (narrow) %v808_v58, 16  ;;  %v842_v59 = vld [vmem:[%s841_s24] sm:$0xff]  ;;  %vm1331_vm13 = vcmask 1044480   ;;  %vm1333_vm14 = vcmask 1045504   ;;  %vm1335_vm15 = vcmask 1046528   ;;  %s879_s28 = scalar_lea.vmem [#allocation8], %s2026_s22 }
 0x340   : >> { %v2042_v8 = vld [vmem:[%s877_s27] sm:$0xff]  ;;  %s1338_s29 = scalar_lea.vmem [#allocation5], %s2026_s22  ;;  %p800_p8 = scmp.ge.s32.totalorder %s803_s21, 2  }
 0x342   : >> { %v2039_v7 = vld [vmem:[%s875_s26] sm:$0xff] }
 0x343   : >> { %v2047_v9 = vmul.f32 %v2042_v8, %v2039_v7  ;;  %v884_v11 = vrot.slane %v2039_v7, %v1963_v21  ;;  %v934_v37 = vrot.slane %v2039_v7, %v1959_v19  ;;  %v1003_v41 = vrot.slane %v2039_v7, %v1955_v17 }
 0x344   : >> { %843 = vxpose.xlu0.b32.start.end [1/1] (short) (narrow) %v842_v59, 16  ;;  %v1050_v55 = vrot.slane %v2039_v7, %v1948_v13 }
 0x345   : >> { %v903_v12 = vrot.slane %v2047_v9, %v1963_v21  ;;  %v885_v22 = vmul.f32 %v884_v11, %v1993_v14  ;;  %v935_v38 = vmul.f32 %v934_v37, %v1993_v14  ;;  %v886_v40 = vmul.f32 %v884_v11, %v1998_v15 }
 0x346   : >> { %v1004_v45 = vmul.f32 %v1003_v41, %v1993_v14  ;;  %v1019_v48 = vrot.slane %v2047_v9, %v1955_v17  ;;  %v936_v50 = vmul.f32 %v934_v37, %v1998_v15  ;;  %v1005_v58 = vmul.f32 %v1003_v41, %v1998_v15 }
 0x347   : >> { %v887_v25 = vmul.f32 %v1814_v18, %v885_v22  ;;  %v950_v18 = vrot.slane %v2047_v9, %v1959_v19  ;;  %v888_v44 = vmul.f32 %v1810_v20, %v886_v40  ;;  %v1096_v37 = vsub.s32 4, %v1938_v10 }
 0x36d   : >> { %1733 = vset.pattern.permute.xlu0 %v1824_v60 }
 0x3bb   : >> { %v825_v61 = vpop.trf.xlu0 }
 0x3bc   : >> { %892 = vperm.xlu1 %1725, %v825_v61  }
 0x3bf   : >> { %v826_v62 = vpop.trf.xlu0 }
 0x3c3   : >> { %v859_v63 = vpop.trf.xlu0 }
 0x3c4   : >> { %1025 = vperm.xlu0 %1733, %v859_v63   ;;  %910 = vperm.xlu1 %1725, %v859_v63  }
 0x3c7   : >> { %v2030_v0 = vpop.trf.xlu0 }
 0x3c8   : >> { %1737 = vset.pattern.permute.xlu0 %v1823_v57  ;;  %1726 = vset.pattern.permute.xlu1 %v1825_v1 }
 0x3c9   : >> { %940 = vperm.xlu1 %1726, %v825_v61   ;;  %915 = vperm.xlu0 %1737, %v2030_v0  }
 0x3cd   : >> { %1727 = vset.pattern.permute.xlu1 %v1824_v60  ;;  %1743 = vset.pattern.permute.xlu0 %v1826_v2 }
 0x3ce   : >> { %1009 = vperm.xlu1 %1727, %v825_v61   ;;  %1222 = vperm.xlu0 %1743, %v826_v62  }
 0x3d2   : >> { %1728 = vset.pattern.permute.xlu1 %v1827_v3  ;;  %1746 = vset.pattern.permute.xlu0 %v1827_v3 }
 0x3d3   : >> { %1056 = vperm.xlu1 %1728, %v825_v61   ;;  %1076 = vperm.xlu0 %1746, %v2030_v0  }
 0x3d7   : >> { %1729 = vset.pattern.permute.xlu1 %v1828_v4  ;;  %1748 = vset.pattern.permute.xlu0 %v1828_v4 }
 0x3d8   : >> { %1103 = vperm.xlu1 %1729, %v825_v61   ;;  %1119 = vperm.xlu0 %1748, %v859_v63  }
 0x3dc   : >> { %1730 = vset.pattern.permute.xlu1 %v1829_v5  ;;  %1751 = vset.pattern.permute.xlu0 %v1829_v5 }
 0x3dd   : >> { %1164 = vperm.xlu1 %1730, %v825_v61   ;;  %1184 = vperm.xlu0 %1751, %v2030_v0  }
 0x3e1   : >> { %1731 = vset.pattern.permute.xlu1 %v1826_v2  ;;  %1753 = vset.pattern.permute.xlu0 %v1830_v6 }
 0x3e2   : >> { %1218 = vperm.xlu1 %1731, %v825_v61   ;;  %1281 = vperm.xlu0 %1753, %v859_v63  }
 0x3e6   : >> { %1732 = vset.pattern.permute.xlu1 %v1825_v1 }
 0x3e7   : >> { %956 = vperm.xlu1 %1732, %v859_v63  }
 0x3eb   : >> { %1734 = vset.pattern.permute.xlu1 %v1827_v3 }
 0x3ec   : >> { %1072 = vperm.xlu1 %1734, %v859_v63  }
 0x3f0   : >> { %1735 = vset.pattern.permute.xlu1 %v1830_v6 }
 0x3f1   : >> { %1265 = vperm.xlu1 %1735, %v825_v61  }
 0x3f5   : >> { %1736 = vset.pattern.permute.xlu1 %v1823_v57 }
 0x3f6   : >> { %897 = vperm.xlu1 %1736, %v826_v62  }
 0x3fa   : >> { %1738 = vset.pattern.permute.xlu1 %v1825_v1 }
 0x3fb   : >> { %944 = vperm.xlu1 %1738, %v826_v62  }
 0x3ff   : >> { %1739 = vset.pattern.permute.xlu1 %v1824_v60 }
 0x400   : >> { %1013 = vperm.xlu1 %1739, %v826_v62  }
 0x404   : >> { %1740 = vset.pattern.permute.xlu1 %v1827_v3  ;;  %v1052_v3 = vmul.f32 %v1050_v55, %v1998_v15 }
 0x405   : >> { %1060 = vperm.xlu1 %1740, %v826_v62  }
 0x409   : >> { %1741 = vset.pattern.permute.xlu1 %v1828_v4 }
 0x40a   : >> { %1107 = vperm.xlu1 %1741, %v826_v62  }
 0x40e   : >> { %1742 = vset.pattern.permute.xlu1 %v1829_v5 }
 0x40f   : >> { %1168 = vperm.xlu1 %1742, %v826_v62  }
 0x413   : >> { %1744 = vset.pattern.permute.xlu1 %v1825_v1 }
 0x414   : >> { %960 = vperm.xlu1 %1744, %v2030_v0  }
 0x418   : >> { %1745 = vset.pattern.permute.xlu1 %v1824_v60 }
 0x419   : >> { %1029 = vperm.xlu1 %1745, %v2030_v0  }
 0x41d   : >> { %1747 = vset.pattern.permute.xlu1 %v1830_v6 }
 0x41e   : >> { %1269 = vperm.xlu1 %1747, %v826_v62   ;;  %v1051_v62 = vmul.f32 %v1050_v55, %v1993_v14 }
 0x422   : >> { %1749 = vset.pattern.permute.xlu1 %v1828_v4 }
 0x423   : >> { %1123 = vperm.xlu1 %1749, %v2030_v0  }
 0x427   : >> { %1750 = vset.pattern.permute.xlu1 %v1829_v5 }
 0x428   : >> { %1180 = vperm.xlu1 %1750, %v859_v63  }
 0x42c   : >> { %1752 = vset.pattern.permute.xlu1 %v1826_v2 }
 0x42d   : >> { %1234 = vperm.xlu1 %1752, %v859_v63   ;;  %v1066_v63 = vrot.slane %v2047_v9, %v1948_v13  ;;  %v1344_v13 = vld [vmem:[%s2222_s8] sm:$0xff] (%p800_p8) }
 0x431   : >> { %1238 = vperm.xlu1 %1752, %v2030_v0  }
 0x435   : >> { %1754 = vset.pattern.permute.xlu1 %v1830_v6 }
 0x436   : >> { %1285 = vperm.xlu1 %1754, %v2030_v0  }
 0x437   : >> { %v893_v23 = vpop.permute.xlu1 %892 }
 0x438   : >> { %v904_v24 = vmul.f32 %v903_v12, %v893_v23 }
 0x43a   : >> { %v906_v26 = vadd.f32 %v904_v24, %v887_v25  ;;  %v1831_v24 = vmov 1966171168  }
 0x43b   : >> { %v976_v25 = vunpack.c.l.s4 %v1831_v24 }
 0x43c   : >> { %v937_v43 = vmul.f32 %v935_v38, %v906_v26 }
 0x43d   : >> { %v977_v40 = vunpack.c.0.s8 %v976_v25 }
 0x43f   : >> { %v911_v27 = vpop.permute.xlu1 %910  ;;  %v2079_v52 = vpop.permute.xlu0 %1025 }
 0x440   : >> { %v918_v28 = vmul.f32 %v911_v27, %v906_v26 }
 0x444   : >> { %v941_v29 = vpop.permute.xlu1 %940  ;;  %v916_v60 = vpop.permute.xlu0 %915 }
 0x445   : >> { %v951_v42 = vmul.f32 %v950_v18, %v941_v29 }
 0x447   : >> { %v953_v47 = vadd.f32 %v951_v42, %v937_v43  ;;  %v920_v42 = vsel %vm487_vm2, %v918_v28, 0.0 }
 0x449   : >> { %v1010_v30 = vpop.permute.xlu1 %1009  ;;  %v1006_v53 = vmul.f32 %v1004_v45, %v953_v47  ;;  %v2088_v11 = vpop.permute.xlu0 %1222  ;;  %v1097_v45 = vrot.slane %v2039_v7, %v1096_v37 }
 0x44a   : >> { %v1020_v54 = vmul.f32 %v1019_v48, %v1010_v30 }
 0x44c   : >> { %v1022_v61 = vadd.f32 %v1020_v54, %v1006_v53  ;;  %v1098_v53 = vmul.f32 %v1097_v45, %v1993_v14  ;;  %v1157_v54 = vsub.s32 5, %v1938_v10 }
 0x44e   : >> { %v1057_v31 = vpop.permute.xlu1 %1056  ;;  %v1053_v4 = vmul.f32 %v1051_v62, %v1022_v61  ;;  %v1077_v30 = vpop.permute.xlu0 %1076  ;;  %v1174_v25 = vrot.slane %v2047_v9, %v1157_v54 }
 0x44f   : >> { %v1067_v5 = vmul.f32 %v1066_v63, %v1057_v31 }
 0x451   : >> { %v1069_v27 = vadd.f32 %v1067_v5, %v1053_v4 }
 0x453   : >> { %v2056_v32 = vpop.permute.xlu1 %1103  ;;  %v1100_v62 = vmul.f32 %v1098_v53, %v1069_v27 }
 0x458   : >> { %v2058_v33 = vpop.permute.xlu1 %1164 }
 0x45d   : >> { %v2060_v34 = vpop.permute.xlu1 %1218 }
 0x462   : >> { %v2062_v35 = vpop.permute.xlu1 %956 }
 0x467   : >> { %v1073_v36 = vpop.permute.xlu1 %1072 }
 0x46c   : >> { %v2069_v39 = vpop.permute.xlu1 %1265 }
 0x471   : >> { %v898_v46 = vpop.permute.xlu1 %897 }
 0x472   : >> { %v905_v49 = vmul.f32 %v903_v12, %v898_v46 }
 0x474   : >> { %v907_v51 = vadd.f32 %v905_v49, %v888_v44 }
 0x476   : >> { %v945_v56 = vpop.permute.xlu1 %944  ;;  %v938_v20 = vmul.f32 %v936_v50, %v907_v51  ;;  %v919_v12 = vmul.f32 %v916_v60, %v907_v51  ;;  %v1113_v51 = vrot.slane %v2047_v9, %v1096_v37 }
 0x477   : >> { %v952_v57 = vmul.f32 %v950_v18, %v945_v56  ;;  %v1079_v18 = vmul.f32 %v1073_v36, %v1069_v27  ;;  %v963_v56 = vmul.f32 %v2062_v35, %v953_v47  ;;  %v1032_v47 = vmul.f32 %v2079_v52, %v1022_v61 }
 0x478   : >> { %v921_v38 = vsel %vm487_vm2, %v919_v12, 0.0  ;;  %v1114_v60 = vmul.f32 %v1113_v51, %v2056_v32 }
 0x479   : >> { %v954_v59 = vadd.f32 %v952_v57, %v938_v20  ;;  %v922_v43 = vadd.f32 %v921_v38, %v920_v42  ;;  %v1081_v46 = vsel %vm487_vm2, %v1079_v18, 0.0  ;;  %v1099_v20 = vmul.f32 %v1097_v45, %v1998_v15 }
 0x47a   : >> { %v1116_v24 = vadd.f32 %v1114_v60, %v1100_v62  ;;  %v1258_v18 = vsub.s32 7, %v1938_v10 }
 0x47b   : >> { %v1014_v0 = vpop.permute.xlu1 %1013  ;;  %v1007_v1 = vmul.f32 %v1005_v58, %v954_v59  ;;  %v923_v36 = vrot.slane %v922_v43, 4 }
 0x47c   : >> { %v1021_v2 = vmul.f32 %v1019_v48, %v1014_v0  ;;  %v2097_v48 = vsub.s32 %v977_v40, %v1938_v10 }
 0x47d   : >> { %v924_v57 = vadd.f32 %v923_v36, %v922_v43  ;;  %v1175_v43 = vmul.f32 %v1174_v25, %v2058_v33 }
 0x47e   : >> { %v1023_v6 = vadd.f32 %v1021_v2, %v1007_v1  ;;  %v981_v28 = vrot.slane %v2042_v8, %v2097_v48 }
 0x480   : >> { %v1061_v22 = vpop.permute.xlu1 %1060  ;;  %v1054_v23 = vmul.f32 %v1052_v3, %v1023_v6  ;;  %v982_v1 = vcombine.high %v981_v28, %v981_v28  ;;  %v965_v3 = vsel %vm487_vm2, %v963_v56, 0.0  ;;  %v1120_v56 = vpop.permute.xlu0 %1119 }
 0x481   : >> { %v1068_v26 = vmul.f32 %v1066_v63, %v1061_v22  ;;  %v1158_v63 = vrot.slane %v2039_v7, %v1157_v54  ;;  %v925_v22 = vrot.slane %v924_v57, 2  ;;  %v989_v54 = vrot.slane %v981_v28, %v2097_v48 }
 0x482   : >> { %v1126_v60 = vmul.f32 %v1120_v56, %v1116_v24 }
 0x483   : >> { %v1070_v29 = vadd.f32 %v1068_v26, %v1054_v23  ;;  %v1211_v23 = vsub.s32 6, %v1938_v10  ;;  %v1159_v32 = vmul.f32 %v1158_v63, %v1993_v14  ;;  %v996_v26 = vrot.slane %v982_v1, %v2097_v48  ;;  %v1345_v10 = vld [vmem:[%s2222_s8 + $0x8] sm:$0xff] (%p800_p8) }
 0x484   : >> { %v1160_v52 = vmul.f32 %v1158_v63, %v1998_v15  ;;  %v926_v61 = vadd.f32 %v925_v22, %v924_v57  ;;  %v1259_v57 = vrot.slane %v2039_v7, %v1258_v18  ;;  %v929_v63 = vmul.f32 %v2042_v8, %v2003_v16 }
 0x485   : >> { %v1080_v41 = vmul.f32 %v1077_v30, %v1070_v29  ;;  %v1108_v31 = vpop.permute.xlu1 %1107  ;;  %v1101_v4 = vmul.f32 %v1099_v20, %v1070_v29  ;;  %v1212_v37 = vrot.slane %v2039_v7, %v1211_v23  ;;  %v1161_v42 = vmul.f32 %v1159_v32, %v1116_v24 }
 0x486   : >> { %v1115_v5 = vmul.f32 %v1113_v51, %v1108_v31  ;;  %v2122_v45 = vrot.slane %v2047_v9, %v1211_v23  ;;  %v927_v33 = vrot.slane %v926_v61, 1  ;;  %v1128_v24 = vsel %vm487_vm2, %v1126_v60, 0.0 }
 0x487   : >> { %v1082_v44 = vsel %vm487_vm2, %v1080_v41, 0.0  ;;  %v1034_v41 = vsel %vm487_vm2, %v1032_v47, 0.0  ;;  %v1213_v20 = vmul.f32 %v1212_v37, %v1993_v14  ;;  %v1177_v62 = vadd.f32 %v1175_v43, %v1161_v42 }
 0x488   : >> { %v1083_v49 = vadd.f32 %v1082_v44, %v1081_v46  ;;  %v1117_v38 = vadd.f32 %v1115_v5, %v1101_v4  ;;  %v1043_v4 = vcombine.high %v989_v54, %v989_v54  ;;  %v1214_v7 = vmul.f32 %v1212_v37, %v1998_v15 }
 0x489   : >> { %v928_v22 = vadd.f32 %v927_v33, %v926_v61  ;;  %v1137_v47 = vcombine.high %v2042_v8, %v2042_v8  ;;  %v1215_v32 = vmul.f32 %v1213_v20, %v1177_v62  ;;  %v1260_v8 = vmul.f32 %v1259_v57, %v1993_v14 }
 0x48a   : >> { %v1169_v50 = vpop.permute.xlu1 %1168  ;;  %v1084_v55 = vrot.slane %v1083_v49, 4  ;;  %v1162_v51 = vmul.f32 %v1160_v52, %v1117_v38  ;;  %v1045_v37 = vmul.f32 %v1043_v4, %v2003_v16  ;;  %v1275_v43 = vrot.slane %v2047_v9, %v1258_v18 }
 0x48b   : >> { %v1176_v53 = vmul.f32 %v1174_v25, %v1169_v50  ;;  %v998_v50 = vmul.f32 %v996_v26, %v2003_v16  ;;  %v1230_v9 = vmul.f32 %v2122_v45, %v2088_v11 }
 0x48c   : >> { %v1085_v2 = vadd.f32 %v1084_v55, %v1083_v49  ;;  %v1276_v18 = vmul.f32 %v1275_v43, %v2069_v39 }
 0x48e   : >> { %v1086_v27 = vrot.slane %v1085_v2, 2 }
 0x48f   : >> { %v961_v58 = vpop.permute.xlu1 %960 }
 0x490   : >> { %v964_v0 = vmul.f32 %v961_v58, %v954_v59  ;;  %v1087_v46 = vadd.f32 %v1086_v27, %v1085_v2 }
 0x492   : >> { %v966_v12 = vsel %vm487_vm2, %v964_v0, 0.0  ;;  %v1088_v2 = vrot.slane %v1087_v46, 1 }
 0x493   : >> { %v967_v35 = vadd.f32 %v966_v12, %v965_v3  ;;  %v1178_v3 = vadd.f32 %v1176_v53, %v1162_v51 }
 0x494   : >> { %v1030_v59 = vpop.permute.xlu1 %1029  ;;  %v1089_v27 = vadd.f32 %v1088_v2, %v1087_v46 }
 0x495   : >> { %v968_v30 = vrot.slane %v967_v35, 4  ;;  %v1033_v29 = vmul.f32 %v1030_v59, %v1023_v6  ;;  %v1090_v6 = vcombine.high %v996_v26, %v996_v26  ;;  %v1185_v59 = vpop.permute.xlu0 %1184  ;;  %v1229_v26 = vmul.f32 %v2122_v45, %v2060_v34 }
 0x496   : >> { %v1216_v53 = vmul.f32 %v1214_v7, %v1178_v3 }
 0x497   : >> { %v969_v40 = vadd.f32 %v968_v30, %v967_v35  ;;  %v1035_v31 = vsel %vm487_vm2, %v1033_v29, 0.0  ;;  %v1092_v1 = vmul.f32 %v1090_v6, %v2003_v16  ;;  %v1231_v46 = vadd.f32 %v1229_v26, %v1215_v32 }
 0x498   : >> { %v1036_v44 = vadd.f32 %v1035_v31, %v1034_v41  ;;  %v1144_v31 = vrot.slane %v1137_v47, %v2097_v48 }
 0x499   : >> { %v970_v49 = vrot.slane %v969_v40, 2  ;;  %v2124_v36 = vpop.permute.xlu1 %1269 }
 0x49a   : >> { %v1037_v55 = vrot.slane %v1036_v44, 4  ;;  %v1151_v33 = vrot.slane %v1144_v31, %v2097_v48  ;;  %v1277_v39 = vmul.f32 %v1275_v43, %v2124_v36 }
 0x49b   : >> { %v971_v58 = vadd.f32 %v970_v49, %v969_v40  ;;  %v1188_v40 = vmul.f32 %v1185_v59, %v1178_v3  ;;  %v1093_v49 = vadd.f32 %v1092_v1, %v1089_v27  ;;  %v1198_v1 = vcombine.high %v1144_v31, %v1144_v31  ;;  %v1282_v59 = vpop.permute.xlu0 %1281 }
 0x49c   : >> { %v1038_v0 = vadd.f32 %v1037_v55, %v1036_v44  ;;  %v1153_v45 = vmul.f32 %v1151_v33, %v2003_v16 }
 0x49d   : >> { %v972_v28 = vrot.slane %v971_v58, 1  ;;  %v1190_v20 = vsel %vm487_vm2, %v1188_v40, 0.0 }
 0x49e   : >> { %v1039_v5 = vrot.slane %v1038_v0, 2  ;;  %v1124_v12 = vpop.permute.xlu1 %1123 }
 0x49f   : >> { %v973_v35 = vadd.f32 %v972_v28, %v971_v58  ;;  %v1127_v23 = vmul.f32 %v1124_v12, %v1117_v38  ;;  %v930_v38 = vadd.f32 %v929_v63, %v928_v22  ;;  %v1262_v28 = vmul.f32 %v1260_v8, %v1231_v46 }
 0x4a0   : >> { %v1040_v25 = vadd.f32 %v1039_v5, %v1038_v0  ;;  %v1310_v0 = vrot.slane %v1093_v49, 5  ;;  %v1232_v5 = vadd.f32 %v1230_v9, %v1216_v53  ;;  %v1252_v49 = vcombine.high %v1151_v33, %v1151_v33 }
 0x4a1   : >> { %v999_v30 = vadd.f32 %v998_v50, %v973_v35  ;;  %v1129_v29 = vsel %vm487_vm2, %v1127_v23, 0.0  ;;  %v1261_v50 = vmul.f32 %v1259_v57, %v1998_v15  ;;  %v2154_v18 = vadd.f32 %v1276_v18, %v1262_v28  }
 0x4a2   : >> { %v1041_v52 = vrot.slane %v1040_v25, 1  ;;  %v1130_v61 = vadd.f32 %v1129_v29, %v1128_v24  ;;  %v1205_v23 = vrot.slane %v1198_v1, %v2097_v48 }
 0x4a3   : >> { %v1304_v41 = vrot.slane %v999_v30, 7  ;;  %v1181_v42 = vpop.permute.xlu1 %1180  ;;  %v2224_v11 = vmov %v2154_v18 }
 0x4a4   : >> { %v1042_v44 = vadd.f32 %v1041_v52, %v1040_v25  ;;  %v1131_v34 = vrot.slane %v1130_v61, 4  ;;  %v1187_v6 = vmul.f32 %v1181_v42, %v1177_v62  ;;  %v1263_v25 = vmul.f32 %v1261_v50, %v1232_v5  ;;  %1340 = vst.msk [vmem:[#allocation2] sm:$0xff] (%p800_p8), %vm487_vm2, %v2224_v11 }
 0x4a5   : >> { %v1325_v51 = vsel %vm1324_vm10, %v930_v38, %v1304_v41  ;;  %v1288_v36 = vmul.f32 %v1282_v59, %v2224_v11  ;;  %v1299_v18 = vcombine.high %v1205_v23, %v1205_v23 }
 0x4a6   : >> { %v1046_v54 = vadd.f32 %v1045_v37, %v1042_v44  ;;  %v1132_v55 = vadd.f32 %v1131_v34, %v1130_v61  ;;  %v1189_v56 = vsel %vm487_vm2, %v1187_v6, 0.0  ;;  %v1279_v52 = vadd.f32 %v1277_v39, %v1263_v25   ;;  %v1346_v39 = vld [vmem:[%s2222_s8 + $0x10] sm:$0xff] (%p800_p8) }
 0x4a7   : >> { %v1191_v58 = vadd.f32 %v1190_v20, %v1189_v56  ;;  %v1207_v61 = vmul.f32 %v1205_v23, %v2003_v16  ;;  %v1290_v44 = vsel %vm487_vm2, %v1288_v36, 0.0  ;;  %v1301_v1 = vmul.f32 %v1299_v18, %v2003_v16 }
 0x4a8   : >> { %v1307_v60 = vrot.slane %v1046_v54, 6  ;;  %v1133_v62 = vrot.slane %v1132_v55, 2  ;;  %v1235_v63 = vpop.permute.xlu1 %1234  ;;  %v2226_v18 = vmov %v2224_v11  ;;  %1341 = vst.msk [vmem:[#allocation2 + $0x8] sm:$0xff] (%p800_p8), %vm487_vm2, %v1279_v52 }
 0x4a9   : >> { %v1192_v2 = vrot.slane %v1191_v58, 4  ;;  %v1241_v22 = vmul.f32 %v1235_v63, %v1231_v46 }
 0x4aa   : >> { %v1326_v3 = vsel %vm665_vm3, %v1325_v51, %v1307_v60  ;;  %v1134_v4 = vadd.f32 %v1133_v62, %v1132_v55 }
 0x4ab   : >> { %v1328_v12 = vsel %vm1327_vm11, %v1326_v3, %v1310_v0  ;;  %v1193_v7 = vadd.f32 %v1192_v2, %v1191_v58  ;;  %v1243_v27 = vsel %vm487_vm2, %v1241_v22, 0.0  ;;  %v1254_v58 = vmul.f32 %v1252_v49, %v2003_v16  ;;  %v1347_v22 = vld [vmem:[%s2222_s8 + $0x18] sm:$0xff] (%p800_p8) }
 0x4ac   : >> { %v1135_v35 = vrot.slane %v1134_v4, 1  ;;  %v1239_v47 = vpop.permute.xlu1 %1238  ;;  %1613 = vmatprep.subr.mxu0 (%p800_p8), %v1347_v22 }
 0x4ad   : >> { %v1194_v57 = vrot.slane %v1193_v7, 2  ;;  %v1242_v24 = vmul.f32 %v1239_v47, %v1232_v5  ;;  %1614 = vmatpush3.msra.mxu0 (%p800_p8), %v1347_v22 }
 0x4ae   : >> { %v1136_v32 = vadd.f32 %v1135_v35, %v1134_v4  ;;  %v880_v4 = vld [vmem:[%s879_s28] sm:$0xff]  ;;  %1615 = vmatprep.subr.mxu0 (%p800_p8), %v1346_v39 }
 0x4af   : >> { %v1195_v26 = vadd.f32 %v1194_v57, %v1193_v7  ;;  %v1244_v30 = vsel %vm487_vm2, %v1242_v24, 0.0  ;;  %1616 = vmatpush3.msra.mxu0 (%p800_p8), %v1346_v39 }
 0x4b0   : >> { %v1154_v29 = vadd.f32 %v1153_v45, %v1136_v32  ;;  %v1245_v37 = vadd.f32 %v1244_v30, %v1243_v27  ;;  %1617 = vmatprep.subr.mxu0 (%p800_p8), %v1345_v10 }
 0x4b1   : >> { %v1196_v40 = vrot.slane %v1195_v26, 1  ;;  %v1286_v48 = vpop.permute.xlu1 %1285  ;;  %1618 = vmatpush3.msra.mxu0 (%p800_p8), %v1345_v10 }
 0x4b2   : >> { %v1313_v8 = vrot.slane %v1154_v29, 4  ;;  %v1246_v38 = vrot.slane %v1245_v37, 4  ;;  %v1289_v41 = vmul.f32 %v1286_v48, %v1279_v52  ;;  %1619 = vmatprep.subr.mxu0 (%p800_p8), %v1344_v13 }
 0x4b3   : >> { %v1197_v31 = vadd.f32 %v1196_v40, %v1195_v26  ;;  %1620 = vmatpush3.msra.mxu0 (%p800_p8), %v1344_v13 }
 0x4b4   : >> { %v1330_v42 = vsel %vm1329_vm12, %v1328_v12, %v1313_v8  ;;  %v1247_v43 = vadd.f32 %v1246_v38, %v1245_v37  ;;  %v1291_v34 = vsel %vm487_vm2, %v1289_v41, 0.0 }
 0x4b5   : >> { %v1208_v6 = vadd.f32 %v1207_v61, %v1197_v31  ;;  %v1292_v46 = vadd.f32 %v1291_v34, %v1290_v44 }
 0x4b6   : >> { %v1248_v51 = vrot.slane %v1247_v43, 2 }
 0x4b7   : >> { %v1316_v53 = vrot.slane %v1208_v6, 3  ;;  %v1293_v54 = vrot.slane %v1292_v46, 4 }
 0x4b8   : >> { %v1249_v55 = vadd.f32 %v1248_v51, %v1247_v43 }
 0x4b9   : >> { %v1332_v56 = vsel %vm1331_vm13, %v1330_v42, %v1316_v53  ;;  %v1294_v20 = vadd.f32 %v1293_v54, %v1292_v46 }
 0x4ba   : >> { %v1250_v9 = vrot.slane %v1249_v55, 1 }
 0x4bb   : >> { %v1295_v60 = vrot.slane %v1294_v20, 2 }
 0x4bc   : >> { %v1251_v62 = vadd.f32 %v1250_v9, %v1249_v55 }
 0x4bd   : >> { %v1296_v63 = vadd.f32 %v1295_v60, %v1294_v20  ;;  %v2225_v20 = vmov %v1279_v52 }
 0x4be   : >> { %v1255_v0 = vadd.f32 %v1254_v58, %v1251_v62 }
 0x4bf   : >> { %v1297_v33 = vrot.slane %v1296_v63, 1 }
 0x4c0   : >> { %v1319_v2 = vrot.slane %v1255_v0, 2 }
 0x4c1   : >> { %v1298_v50 = vadd.f32 %v1297_v33, %v1296_v63 }
 0x4c2   : >> { %v1334_v28 = vsel %vm1333_vm14, %v1332_v56, %v1319_v2 }
 0x4c3   : >> { %v1302_v3 = vadd.f32 %v1301_v1, %v1298_v50 }
 0x4c5   : >> { %v1322_v5 = vrot.slane %v1302_v3, 1 }
 0x4c6   : > { %802 = sbr.rel (!%p800_p8) target bundleno = 828 (0x33c), region = 103 }
 0x4c7   : >> { %v1336_v12 = vsel %vm1335_vm15, %v1334_v28, %v1322_v5 }
 0x4c8   : >> { %v1337_v7 = vmul.f32 %v1336_v12, %v880_v4 }
 0x4ca   : >> { %1339 = vst.msk [vmem:[%s1338_s29] sm:$0xff] %vm487_vm2, %v1337_v7 }
 0x4d1   : > { %v1342_v45 = vld [vmem:[#allocation5] sm:$0xff]  ;;  %v1343_v17 = vld [vmem:[#allocation5 + $0x8] sm:$0xff] }
 0x4d2   : > { %1621 = vmatprep.mubr.msk.f32.mxu0 %vm487_vm2, %v1342_v45 }
 0x4d3   : > { %1622 = vmatmul.mubr.msk.f32.vlgmr.msra.gmra.mxu0 %vm487_vm2, %v1343_v17 }
 0x593   : > { %v1623_v19 = vpop.f32.mrf.mxu0 }
 0x594   : > { %1430 = vst.msk [vmem:[%s1918_s25 + $0x8] sm:$0xff] %vm383_vm1, %v1623_v19 }
 0x595   : > { %v1420_v21 = vpop.f32.mrf.mxu0 }
 0x596   : > { %1429 = vst.msk [vmem:[%s1918_s25] sm:$0xff] %vm383_vm1, %v1420_v21 }
 0x597 PF: > { %s19_s13 = sadd.s32 1, %s1806_s13   ;;  %s2227_s30 = smov %s1798_s11 }
 0x598   : > { %p16_p9 = scmp.ge.s32.totalorder %s19_s13, 6   ;;  %s2228_s10 = smov %s1802_s12 }
 0x599   : > { %s2229_s11 = smov %s2232_s14  ;;  %s2230_s12 = smov %s2236_s15 }
 0x59a   :  { %18 = sbr.rel (!%p16_p9) target bundleno = 3 (0x3), region = 114 }

</bundles_post_ra>
